<compile_context>
chip_gen: v7x
topology: tpu7x:2x2x1
jax: 0.10.0
libtpu: 0.0.40
codegen_flags: <defaults>
</compile_context>

<pallas_src>
import functools

import numpy as np
import jax
import jax.numpy as jnp
from jax.experimental import pallas as pl
from jax.experimental.pallas import tpu as pltpu


# ----------------------------------------------------------------------------
# Wavelet filter banks (pywt conventions) and DWT/IDWT matrix construction.
# ----------------------------------------------------------------------------
_BIOR_LO = {
    # name: (dec_lo, rec_lo)  -- dec_hi / rec_hi derived below (pywt relation)
    'bior1.1': (np.array([1.0, 1.0]) / np.sqrt(2.0),
                np.array([1.0, 1.0]) / np.sqrt(2.0)),
    'bior2.2': (np.sqrt(2.0) * np.array([0., -1., 2., 6., 2., -1.]) / 8.0,
                np.sqrt(2.0) * np.array([0., 2., 4., 2., 0., 0.]) / 8.0),
    'bior3.3': (np.sqrt(2.0) * np.array([3., -9., -7., 45., 45., -7., -9., 3.]) / 64.0,
                np.sqrt(2.0) * np.array([1., 3., 3., 1., 0., 0., 0., 0.]) / 8.0),
}


def _filter_bank(name):
    dec_lo, rec_lo = _BIOR_LO[name]
    n = np.arange(len(dec_lo))
    dec_hi = ((-1.0) ** (n + 1)) * rec_lo
    rec_hi = ((-1.0) ** n) * dec_lo
    return dec_lo, dec_hi, rec_lo, rec_hi


def _analysis_matrix(filt, n):
    """Matrix form of pytorch_wavelets afb1d: zero-pad, stride-2 conv with
    the reversed filter (i.e. true convolution with `filt`)."""
    filt = np.asarray(filt, np.float64)
    L = len(filt)
    out = (n + L - 1) // 2                 # pywt.dwt_coeff_len, mode='zero'
    p = 2 * (out - 1) - n + L
    pad_left = p // 2
    rev = filt[::-1]
    M = np.zeros((out, n), np.float64)
    for k in range(out):
        for t in range(L):
            j = 2 * k + t - pad_left
            if 0 <= j < n:
                M[k, j] += rev[t]
    return M


def _synthesis_matrix(filt, n, no):
    """Matrix form of pytorch_wavelets sfb1d: conv_transpose, stride 2,
    padding L-2 with the (non-reversed) reconstruction filter."""
    filt = np.asarray(filt, np.float64)
    L = len(filt)
    assert 2 * no - L + 2 == n
    S = np.zeros((n, no), np.float64)
    for k in range(no):
        for t in range(L):
            i = 2 * k + t - (L - 2)
            if 0 <= i < n:
                S[i, k] += filt[t]
    return S


def _build_mats(name, n):
    """Returns (n_out, A^T (n*n, 4*no*no), [S00^T, S10^T, S01^T, S11^T])."""
    dec_lo, dec_hi, rec_lo, rec_hi = _filter_bank(name)
    Alo, Ahi = _analysis_matrix(dec_lo, n), _analysis_matrix(dec_hi, n)
    no = Alo.shape[0]
    Slo, Shi = _synthesis_matrix(rec_lo, n, no), _synthesis_matrix(rec_hi, n, no)
    # vec_rowmajor(Mh @ X @ Mw^T) = kron(Mh, Mw) @ vec_rowmajor(X)
    # subband order (pytorch_wavelets): LL, (lo_w,hi_h), (hi_w,lo_h), (hi_w,hi_h)
    A = np.concatenate([np.kron(Alo, Alo), np.kron(Ahi, Alo),
                        np.kron(Alo, Ahi), np.kron(Ahi, Ahi)], axis=0)
    S = [np.kron(Slo, Slo), np.kron(Shi, Slo),
         np.kron(Slo, Shi), np.kron(Shi, Shi)]
    return no, A.T.copy(), [s.T.copy() for s in S]


@functools.lru_cache(maxsize=None)
def _fused_operators(wavelets, n_pos, n_vel, amp):
    """Collapsed operators (float32), built in f64 and uploaded to device ONCE.

      G      : (nw, V2, V2)  velocity LL analysis @ LL synthesis (per wavelet)
      Mp     : (nw, P2, P2)  position-axis DWT -> amplify -> IDWT operator
      Hv_sum : (V2, V2)      sum over wavelets of (hi analysis -> amp -> synth)

    Per-wavelet output:  Mp_w @ (X @ G_w);  plus X @ Hv_sum added exactly once.
    """
    P, V = n_pos, n_vel
    P2, V2 = P * P, V * V
    nw = len(wavelets)

    G = np.zeros((nw, V2, V2))
    Mp = np.zeros((nw, P2, P2))
    Hv_sum = np.zeros((V2, V2))
    for i, w in enumerate(wavelets):
        Vo, Av, Sv = _build_mats(w, V)
        _Po, Ap, Sp = _build_mats(w, P)
        Vo2 = Vo * Vo
        # LL path: fold analysis@synthesis into one V2 x V2 operator.
        G[i] = Av[:, :Vo2] @ Sv[0]
        # velocity high-pass path: analysis -> amp -> synthesis, summed over w.
        S_hi_amp = amp * np.concatenate([Sv[1], Sv[2], Sv[3]], axis=0)
        Hv_sum += Av[:, Vo2:] @ S_hi_amp
        # position path applied to ll1 as a left-multiply (no permutes needed)
        Sp_amp = np.concatenate([Sp[0], amp * Sp[1], amp * Sp[2], amp * Sp[3]],
                                axis=0)
        Mp[i] = (Ap @ Sp_amp).T

    return (jnp.asarray(G, jnp.float32),
            jnp.asarray(Mp, jnp.float32),
            jnp.asarray(Hv_sum, jnp.float32))


# ----------------------------------------------------------------------------
# Pallas kernel: whole forward. grid = (ncol, n_wavelets); the wavelet axis is
# an "arbitrary" reduction (accumulator stays VMEM-resident); the leading
# "parallel" axis column-splits the output so v7x's 2 TensorCores share work.
# ----------------------------------------------------------------------------
def _wavenet_kernel(x_ref, g_ref, mp_ref, hv_ref, o_ref):
    w = pl.program_id(1)                       # wavelet (reduction) axis

    x = x_ref[...]                                                      # (P2,V2)
    xg = jnp.dot(x, g_ref[...], preferred_element_type=jnp.float32)    # (P2,Vh)
    y = jnp.dot(mp_ref[...], xg, preferred_element_type=jnp.float32)   # (P2,Vh)

    @pl.when(w == 0)
    def _():
        # First wavelet: initialize this output column-slice directly with the
        # pre-summed high-pass contribution (no zero-store, no extra add).
        o_ref[...] = y + jnp.dot(x, hv_ref[...],
                                 preferred_element_type=jnp.float32)

    @pl.when(w > 0)
    def _():
        o_ref[...] += y


def _num_tensorcores():
    """Best-effort TensorCores-per-chip count (2 on v7x); defaults to 1."""
    get_info = getattr(pltpu, "get_tpu_info", None)
    if get_info is None:
        return 1
    try:
        info = get_info()
    except Exception:
        return 1
    for attr in ("num_cores", "num_tensorcores", "tensorcores_per_chip",
                 "cores_per_chip", "core_count"):
        v = getattr(info, attr, None)
        if isinstance(v, (int, np.integer)) and v >= 1:
            return int(v)
    return 1


# ----------------------------------------------------------------------------
# WaveNet.forward
# ----------------------------------------------------------------------------
def wavenet_forward(x, n_pos, n_vel,
                    wavelets=('bior1.1', 'bior2.2', 'bior3.3'),
                    J=1, scales=(0,), amplification=100.0):
    """x: (n_pos, n_pos, n_vel, n_vel) -- torch NCHW with N=C=n_pos, H=W=n_vel."""
    assert x.shape[0] == x.shape[1] and x.shape[0] == n_pos
    assert x.shape[2] == x.shape[3] and x.shape[2] == n_vel
    assert J == 1  # TODO(synk): only J=1 (the module default) is implemented.
    # TODO(synk): the reference default scales=[1,2,3] indexes past the end of
    # the J=1 high-pass list (IndexError in torch); we amplify the single
    # available J=1 high-pass level (scales=(0,)) instead.
    amp = float(amplification) if 0 in scales else 1.0

    P, V = n_pos, n_vel
    P2, V2 = P * P, V * V
    G, Mp, Hv_sum = _fused_operators(tuple(wavelets), P, V, amp)
    nw = G.shape[0]

    # Column-split the V2 (lane) axis across TensorCores when the chip has 2
    # (v7x); each half stays a lane-dense multiple of 128. No-op otherwise.
    ncol = 2 if (_num_tensorcores() >= 2 and V2 % 256 == 0) else 1
    Vh = V2 // ncol

    x_flat = x.reshape(P2, V2).astype(jnp.float32)

    out = pl.pallas_call(
        _wavenet_kernel,
        out_shape=jax.ShapeDtypeStruct((P2, V2), jnp.float32),
        grid=(ncol, nw),
        in_specs=[
            # x: block index constant -> DMA'd into VMEM once, stays resident
            pl.BlockSpec((P2, V2), lambda j, i: (0, 0)),
            # per-wavelet fused LL operator, column-sliced for the parallel axis
            pl.BlockSpec((None, V2, Vh), lambda j, i: (i, 0, j)),
            # per-wavelet position operator (full; left-multiplies the LL term)
            pl.BlockSpec((None, P2, P2), lambda j, i: (i, 0, 0)),
            # pre-summed high-pass operator: one column-slice per core, loaded once
            pl.BlockSpec((V2, Vh), lambda j, i: (0, j)),
        ],
        # output block index constant along the wavelet axis -> VMEM-resident
        # accumulator across wavelets; distinct column-slice per parallel index
        out_specs=pl.BlockSpec((P2, Vh), lambda j, i: (0, j)),
        compiler_params=pltpu.CompilerParams(
            dimension_semantics=("parallel", "arbitrary")),
    )(x_flat, G, Mp, Hv_sum)
    return out.reshape(P, P, V, V)


# ----------------------------------------------------------------------------
# Pure-numpy reference of the original (uncollapsed) linear algebra.
# ----------------------------------------------------------------------------
def _reference(xnp, n_pos, n_vel, wavelets, amp):
    P, V = n_pos, n_vel
    acc = np.zeros((P * P, V * V), np.float64)
    for w in wavelets:
        Vo, Av, Sv = _build_mats(w, V)
        _Po, Ap, Sp = _build_mats(w, P)
        y1 = xnp.reshape(P * P, V * V) @ Av
        ll1, lh1, hl1, hh1 = np.split(y1, 4, axis=1)
        o = ll1.reshape(P, P, Vo, Vo).transpose(2, 3, 0, 1)
        y2 = o.reshape(Vo * Vo, P * P) @ Ap
        ll2, lh2, hl2, hh2 = np.split(y2, 4, axis=1)
        o = ll2 @ Sp[0] + amp * (lh2 @ Sp[1] + hl2 @ Sp[2] + hh2 @ Sp[3])
        o = o.reshape(Vo, Vo, P, P).transpose(2, 3, 0, 1)
        y = (o.reshape(P * P, Vo * Vo) @ Sv[0]
             + amp * (lh1 @ Sv[1] + hl1 @ Sv[2] + hh1 @ Sv[3]))
        acc += y
    return acc.reshape(P, P, V, V)


if __name__ == "__main__":
    n_pos = n_vel = 16
    key = jax.random.PRNGKey(0)
    x = jax.random.normal(key, (n_pos, n_pos, n_vel, n_vel), dtype=jnp.float32)

    out = wavenet_forward(x, n_pos, n_vel)
    out = jax.block_until_ready(out)

    assert out.shape == (n_pos, n_pos, n_vel, n_vel)
    ref = _reference(np.asarray(x, np.float64), n_pos, n_vel,
                     ('bior1.1', 'bior2.2', 'bior3.3'), 100.0)
    assert np.allclose(np.asarray(out), ref, rtol=2e-3, atol=5e-2)
    print("KERNEL_OK")
</pallas_src>

<mosaic_0001>
module attributes {stable_mosaic.version = 11 : i64} {
  func.func @_wavenet_kernel(%arg0: i32, %arg1: i32, %arg2: memref<256x256xf32, #tpu.memory_space<vmem>>, %arg3: memref<1x256x256xf32, #tpu.memory_space<vmem>>, %arg4: memref<1x256x256xf32, #tpu.memory_space<vmem>>, %arg5: memref<256x256xf32, #tpu.memory_space<vmem>>, %arg6: memref<256x256xf32, #tpu.memory_space<vmem>>) attributes {dimension_semantics = [#tpu.dimension_semantics<parallel>, #tpu.dimension_semantics<arbitrary>], iteration_bounds = array<i64: 1, 3>, scalar_prefetch = 0 : i64, scratch_operands = 0 : i64, tpu.core_type = #tpu.core_type<tc>, window_params = [{pipeline_mode = #tpu.pipeline_mode<synchronous>, transform_indices = @transform_0, window_bounds = array<i64: 256, 256>}, {transform_indices = @transform_1, window_bounds = array<i64: 1, 256, 256>}, {transform_indices = @transform_2, window_bounds = array<i64: 1, 256, 256>}, {transform_indices = @transform_3, window_bounds = array<i64: 256, 256>}, {transform_indices = @transform_4, window_bounds = array<i64: 256, 256>}]} {
    %c0 = arith.constant 0 : index
    %c0_0 = arith.constant 0 : index
    %0 = vector.load %arg2[%c0, %c0_0] : memref<256x256xf32, #tpu.memory_space<vmem>>, vector<256x256xf32>
    %c0_1 = arith.constant 0 : index
    %c0_2 = arith.constant 0 : index
    %c0_3 = arith.constant 0 : index
    %1 = vector.load %arg3[%c0_1, %c0_2, %c0_3] : memref<1x256x256xf32, #tpu.memory_space<vmem>>, vector<1x256x256xf32>
    %2 = vector.shape_cast %1 : vector<1x256x256xf32> to vector<256x256xf32>
    %cst = arith.constant dense<0.000000e+00> : vector<256x256xf32>
    %3 = tpu.matmul %0, %2, %cst {dimension_numbers = #tpu.dot_dimension_numbers<[1], [0], [0], [1], [0, 0, 1, 1], [], []>} : vector<256x256xf32>, vector<256x256xf32>, vector<256x256xf32> -> vector<256x256xf32>
    %c0_4 = arith.constant 0 : index
    %c0_5 = arith.constant 0 : index
    %c0_6 = arith.constant 0 : index
    %4 = vector.load %arg4[%c0_4, %c0_5, %c0_6] : memref<1x256x256xf32, #tpu.memory_space<vmem>>, vector<1x256x256xf32>
    %5 = vector.shape_cast %4 : vector<1x256x256xf32> to vector<256x256xf32>
    %cst_7 = arith.constant dense<0.000000e+00> : vector<256x256xf32>
    %6 = tpu.matmul %5, %3, %cst_7 {dimension_numbers = #tpu.dot_dimension_numbers<[1], [0], [0], [1], [0, 0, 1, 1], [], []>} : vector<256x256xf32>, vector<256x256xf32>, vector<256x256xf32> -> vector<256x256xf32>
    %c0_i32 = arith.constant 0 : i32
    %7 = arith.cmpi eq, %arg1, %c0_i32 : i32
    %8 = arith.extui %7 : i1 to i32
    %c0_i32_8 = arith.constant 0 : i32
    %9 = arith.cmpi ne, %8, %c0_i32_8 : i32
    scf.if %9 {
      %c0_11 = arith.constant 0 : index
      %c0_12 = arith.constant 0 : index
      %13 = vector.load %arg5[%c0_11, %c0_12] : memref<256x256xf32, #tpu.memory_space<vmem>>, vector<256x256xf32>
      %cst_13 = arith.constant dense<0.000000e+00> : vector<256x256xf32>
      %14 = tpu.matmul %0, %13, %cst_13 {dimension_numbers = #tpu.dot_dimension_numbers<[1], [0], [0], [1], [0, 0, 1, 1], [], []>} : vector<256x256xf32>, vector<256x256xf32>, vector<256x256xf32> -> vector<256x256xf32>
      %15 = arith.addf %6, %14 : vector<256x256xf32>
      %c0_14 = arith.constant 0 : index
      %c0_15 = arith.constant 0 : index
      %16 = vector.load %arg6[%c0_14, %c0_15] : memref<256x256xf32, #tpu.memory_space<vmem>>, vector<256x256xf32>
      tpu.vector_store %arg6[%c0_14, %c0_15], %15 {strides = array<i32>} : memref<256x256xf32, #tpu.memory_space<vmem>>, vector<256x256xf32>,
    } else {
    }
    %c0_i32_9 = arith.constant 0 : i32
    %10 = arith.cmpi sgt, %arg1, %c0_i32_9 : i32
    %11 = arith.extui %10 : i1 to i32
    %c0_i32_10 = arith.constant 0 : i32
    %12 = arith.cmpi ne, %11, %c0_i32_10 : i32
    scf.if %12 {
      %c0_11 = arith.constant 0 : index
      %c0_12 = arith.constant 0 : index
      %13 = vector.load %arg6[%c0_11, %c0_12] : memref<256x256xf32, #tpu.memory_space<vmem>>, vector<256x256xf32>
      %14 = arith.addf %13, %6 : vector<256x256xf32>
      %c0_13 = arith.constant 0 : index
      %c0_14 = arith.constant 0 : index
      %15 = vector.load %arg6[%c0_13, %c0_14] : memref<256x256xf32, #tpu.memory_space<vmem>>, vector<256x256xf32>
      tpu.vector_store %arg6[%c0_13, %c0_14], %14 {strides = array<i32>} : memref<256x256xf32, #tpu.memory_space<vmem>>, vector<256x256xf32>,
    } else {
    }
    return
  }
  func.func @transform_0(%arg0: i32, %arg1: i32) -> (i32, i32) {
    %c0_i32 = arith.constant 0 : i32
    %c0_i32_0 = arith.constant 0 : i32
    %c0_i32_1 = arith.constant 0 : i32
    return %c0_i32, %c0_i32_0 : i32, i32
  }
  func.func @transform_1(%arg0: i32, %arg1: i32) -> (i32, i32, i32) {
    %c0_i32 = arith.constant 0 : i32
    %c0_i32_0 = arith.constant 0 : i32
    return %arg1, %c0_i32, %arg0 : i32, i32, i32
  }
  func.func @transform_2(%arg0: i32, %arg1: i32) -> (i32, i32, i32) {
    %c0_i32 = arith.constant 0 : i32
    %c0_i32_0 = arith.constant 0 : i32
    %c0_i32_1 = arith.constant 0 : i32
    return %arg1, %c0_i32, %c0_i32_0 : i32, i32, i32
  }
  func.func @transform_3(%arg0: i32, %arg1: i32) -> (i32, i32) {
    %c0_i32 = arith.constant 0 : i32
    %c0_i32_0 = arith.constant 0 : i32
    return %c0_i32, %arg0 : i32, i32
  }
  func.func @transform_4(%arg0: i32, %arg1: i32) -> (i32, i32) {
    %c0_i32 = arith.constant 0 : i32
    %c0_i32_0 = arith.constant 0 : i32
    return %c0_i32, %arg0 : i32, i32
  }
}

</mosaic_0001>

<bundles_post_ra>
// kernel: tpu_custom_call.1
= control target key start
LH: loop header
LB: loop body
LE: loop exit
PB: predicated region body
PF: predicated region fallthrough
CT: control target
= control target key end

     0   :  { %9 = vsyncpa [#allocation3], 0  ;;  %s3281_s0 = inlined_call_operand.hbm [shape: f32[256,256], index: 0, kind: input, shape index: {}]   ;;  %s3282_s1 = inlined_call_operand.hbm [shape: f32[3,256,256], index: 1, kind: input, shape index: {}]   ;;  %s3283_s2 = inlined_call_operand.hbm [shape: f32[3,256,256], index: 2, kind: input, shape index: {}]   ;;  %s3284_s3 = inlined_call_operand.hbm [shape: f32[256,256], index: 3, kind: input, shape index: {}]   ;;  %s3285_s4 = inlined_call_operand.hbm [shape: f32[256,256], index: 4, kind: output, shape index: {}]  }
   0x1   :  { %10 = vsyncpa [#allocation6], 0 }
   0x2   :  { %12 = vsyncpa [#allocation6 + $0x1], 0 }
   0x3   :  { %13 = vsyncpa [#allocation9], 0 }
   0x4   :  { %14 = vsyncpa [#allocation4], 0  ;;  %s2358_s15 = smov 0   ;;  %s2360_s16 = smov 0  }
   0x5   :  { %s2362_s17 = smov 0   ;;  %s2364_s18 = smov 0  }
   0x6   :  { %s2366_s19 = smov 0   ;;  %s2368_s20 = smov 0  }
   0x7 LB: > { %s29_s21 = sadd.s32 1, %s2318_s19  ;;  %s62_s22 = sadd.s32 1, %s2310_s17  ;;  %s2322_s20 = sphi %s2368_s20, %s20_s20   ;;  %s2318_s19 = sphi %s2366_s19, %s3544_s19   ;;  %s2314_s18 = sphi %s2364_s18, %s3543_s18   ;;  %s2310_s17 = sphi %s2362_s17, %s3542_s17   ;;  %s2306_s16 = sphi %s2360_s16, %s3541_s16   ;;  %s2302_s15 = sphi %s2358_s15, %s3540_s15  }
   0x8   : > { %p30_p0 = scmp.ge.s32.totalorder %s29_s21, 3  ;;  %p69_p1 = scmp.ne.s32.totalorder %s2310_s17, %s2306_s16 }
   0x9   : > { %p70_p2 = scmp.eq.s32.totalorder %s2322_s20, 0  ;;  %p2058_p5 = scmp.lt.s32.totalorder %s2322_s20, 3 }
   0xa   : > { %s3546_s21 = smov (%p30_p0, %s29_s21), 0  ;;  %s206_s25 = sand.u32 1, %s2322_s20  }
   0xb   : > { %p2395_p3 = por %p70_p2, %p69_p1  ;;  %s57_s24 = ssub.s32 %s2318_s19, %s3546_s21 }
   0xc   : > { %p60_p4 = scmp.eq.s32.totalorder %s57_s24, 0  ;;  %s208_s26 = sand.u32 1, %s2310_s17  }
   0xd   : > { %s2407_s28 = sshll.u32 %s208_s26, 9  ;;  %s1800_s29 = sshll.u32 %s2318_s19, 13 }
   0xe   : > { %s2405_s27 = scalar_select %p60_p4, %s2310_s17, %s62_s22  }
   0xf   : > { %s2413_s6 = scalar_lea.hbm %s3282_s1, %s1800_s29  ;;  %s210_s7 = scalar_lea.vmem [#allocation5], %s2407_s28 }
  0x10   : > { %s219_s8 = sshll.u32 %s210_s7, 4  ;;  %p2420_p6 = pnand %p2058_p5, %p2395_p3  ;;  %s2416_s8 = int_to_ptr.vmem [resolvable:$true] %s219_s8 }
  0x11   : > { %s2427_s12 = scalar_lea.hbm %s3283_s2, %s1800_s29  ;;  %s2429_s13 = scalar_lea.sflag [#allocation6], %s206_s25 }
  0x12   : > { %s2118_s14 = scalar_lea.hbm %s2413_s6, 8192  ;;  %p2120_p8 = pneg %p2420_p6 }
  0x13   : > { %p2119_p7 = scmp.ne.s32.totalorder %s2413_s6, %s2118_s14  ;;  %s2123_s24 = scalar_lea.hbm %s3282_s1, 24576 }
  0x14   : > { %p2124_p11 = scmp.lt.u32.totalorder %s2413_s6, %s3282_s1  ;;  %p2125_p12 = scmp.lt.u32.totalorder %s2123_s24, %s2118_s14 }
  0x15   : > { %p2121_p9 = pnand %p2120_p8, %p2119_p7  ;;  %p2127_p0 = scmp.lt.u32.totalorder %s2118_s14, %s2413_s6 }
  0x16   : > { %p2126_p13 = por %p2125_p12, %p2124_p11 }
  0x17   : > { %p2122_p10 = pneg %p2121_p9 }
  0x18   : > { %p2128_p1 = por %p2127_p0, %p2126_p13 }
  0x1a   : > { %p2129_p2 = pnand %p2128_p1, %p2122_p10 }
  0x1c   : > { %2132 = shalt.err (!%p2129_p2)
}
  0x1d   : > { %s2133_s25 = scalar_lea.vmem %s2416_s8, 8192  ;;  %s2324_s29 = smov [#allocation5]  }
  0x1e   : > { %p2134_p3 = scmp.ne.s32.totalorder %s2416_s8, %s2133_s25  ;;  %s2138_s5 = sshll.u32 %s2324_s29, 4  ;;  %s2139_s5 = int_to_ptr.vmem [resolvable:$false] %s2138_s5 }
  0x1f   : > { %s2140_s7 = scalar_lea.vmem %s2139_s5, 16384  ;;  %p2141_p7 = scmp.lt.s32.totalorder %s2416_s8, %s2139_s5 }
  0x20   : > { %p2136_p4 = pnand %p2134_p3, %p2120_p8  ;;  %p2142_p9 = scmp.lt.s32.totalorder %s2140_s7, %s2133_s25 }
  0x22   : > { %p2137_p5 = pneg %p2136_p4  ;;  %p2143_p11 = por %p2142_p9, %p2141_p7 }
  0x24   : > { %p2144_p12 = pnand %p2143_p11, %p2137_p5 }
  0x26   : > { %2147 = shalt.err (!%p2144_p12)
}
  0x27   : > { %s2325_s10 = smov 256   ;;  %s2326_s11 = smov 16  }
  0x28   : > { %2052 = dma.hbm_to_vmem [thread:$0]  (!%p2420_p6), %s2413_s6, 8192, %s2416_s8, %s2429_s13, %s2325_s10, %s2325_s10, %s2326_s11  }
  0x29   : > { %s233_s14 = scalar_lea.vmem [#allocation7], %s2407_s28  ;;  %s2462_s23 = sadd.s32 4294967295, %s2322_s20  }
  0x2a   : > { %s240_s22 = sshll.u32 %s233_s14, 4  ;;  %p75_p10 = scmp.ne.s32.totalorder %s2306_s16, %s2302_s15  ;;  %s2479_s22 = int_to_ptr.vmem [resolvable:$true] %s240_s22 }
  0x2b   : > { %p3286_p13 = scmp.eq.s32.totalorder %s2462_s23, 0  ;;  %p1779_p0 = scmp.ge.s32.totalorder %s2322_s20, 1 }
  0x2c   : > { %p164_p1 = scmp.lt.s32.totalorder %s2322_s20, 4  ;;  %s2327_s6 = smov [#allocation2]  }
  0x2d   : > { %p2471_p2 = por %p3286_p13, %p75_p10  ;;  %s176_s8 = sshll.u32 %s2327_s6, 4  ;;  %s2483_s8 = int_to_ptr.vmem [resolvable:$true] %s176_s8 }
  0x2e   : > { %p2475_p3 = pnand %p1779_p0, %p164_p1  ;;  %s2328_s15 = smov [#allocation8]  }
  0x2f   : > { %s3310_s24 = scalar_select %p2471_p2, 1, 0 }
  0x30   : > { %s3311_s28 = scalar_select %p2475_p3, 1, 0 }
  0x31   : > { %p2042_p4 = pneg %p2475_p3  ;;  %s192_s26 = sshll.u32 %s2328_s15, 4  ;;  %s2491_s26 = int_to_ptr.vmem [resolvable:$true] %s192_s26 }
  0x32   : > { %s2148_s25 = scalar_lea.hbm %s2427_s12, 8192  ;;  %s2153_s7 = scalar_lea.hbm %s3283_s2, 24576 }
  0x33   : > { %p2487_p5 = pnand %p2042_p4, %p3286_p13  ;;  %p2149_p7 = scmp.ne.s32.totalorder %s2427_s12, %s2148_s25 }
  0x34   : > { %p2154_p12 = scmp.lt.u32.totalorder %s2427_s12, %s3283_s2  ;;  %p2155_p10 = scmp.lt.u32.totalorder %s2153_s7, %s2148_s25 }
  0x35   : > { %p2151_p9 = pnand %p2149_p7, %p2120_p8  ;;  %p2157_p1 = scmp.lt.u32.totalorder %s2148_s25, %s2427_s12 }
  0x36   : > { %p2156_p0 = por %p2155_p10, %p2154_p12 }
  0x37   : > { %p2152_p11 = pneg %p2151_p9 }
  0x38   : > { %p2158_p4 = por %p2157_p1, %p2156_p0 }
  0x3a   : > { %p2159_p13 = pnand %p2158_p4, %p2152_p11 }
  0x3c   : > { %2162 = shalt.err (!%p2159_p13)
}
  0x3d   : > { %s2163_s15 = scalar_lea.vmem %s2479_s22, 8192  ;;  %s2329_s29 = smov [#allocation7]  }
  0x3e   : > { %p2164_p7 = scmp.ne.s32.totalorder %s2479_s22, %s2163_s15  ;;  %s2168_s5 = sshll.u32 %s2329_s29, 4  ;;  %s2169_s5 = int_to_ptr.vmem [resolvable:$false] %s2168_s5 }
  0x3f   : > { %s2170_s14 = scalar_lea.vmem %s2169_s5, 16384  ;;  %p2171_p3 = scmp.lt.s32.totalorder %s2479_s22, %s2169_s5 }
  0x40   : > { %p2166_p9 = pnand %p2164_p7, %p2120_p8  ;;  %p2172_p12 = scmp.lt.s32.totalorder %s2170_s14, %s2163_s15 }
  0x42   : > { %p2167_p2 = pneg %p2166_p9  ;;  %p2173_p10 = por %p2172_p12, %p2171_p3 }
  0x44   : > { %p2174_p0 = pnand %p2173_p10, %p2167_p2 }
  0x46   : > { %2177 = shalt.err (!%p2174_p0)
}
  0x47   : > { %2055 = dma.hbm_to_vmem [thread:$0]  (!%p2420_p6), %s2427_s12, 8192, %s2479_s22, %s2429_s13, %s2325_s10, %s2325_s10, %s2326_s11  }
  0x48   : > { %s2178_s6 = scalar_lea.hbm %s3281_s0, 8192  ;;  %p2180_p13 = pneg %p2487_p5 }
  0x49   : > { %p2179_p8 = scmp.ne.s32.totalorder %s3281_s0, %s2178_s6  ;;  %p2185_p11 = scmp.lt.u32.totalorder %s2178_s6, %s3281_s0 }
  0x4b   : > { %p2181_p2 = pnand %p2180_p13, %p2179_p8 }
  0x4d   : > { %p2182_p3 = pneg %p2181_p2 }
  0x4f   : > { %p2187_p1 = pnand %p2185_p11, %p2182_p3 }
  0x51   : > { %2190 = shalt.err (!%p2187_p1)
}
  0x52   : > { %s2191_s12 = scalar_lea.vmem %s2483_s8, 8192  ;;  %p2199_p9 = scmp.lt.s32.totalorder %s2483_s8, %s2483_s8 }
  0x53   : > { %p2192_p6 = scmp.ne.s32.totalorder %s2483_s8, %s2191_s12  ;;  %p2200_p12 = scmp.lt.s32.totalorder %s2191_s12, %s2191_s12 }
  0x55   : > { %p2194_p4 = pnand %p2192_p6, %p2180_p13  ;;  %p2201_p10 = por %p2200_p12, %p2199_p9 }
  0x57   : > { %p2195_p7 = pneg %p2194_p4 }
  0x59   : > { %p2202_p0 = pnand %p2201_p10, %p2195_p7 }
  0x5b   : > { %2205 = shalt.err (!%p2202_p0)
}
  0x5c   : > { %2045 = dma.hbm_to_vmem [thread:$0]  (!%p2487_p5), %s3281_s0, 8192, %s2483_s8, [#allocation3], %s2325_s10, %s2325_s10, %s2326_s11  }
  0x5d   : > { %s2206_s7 = scalar_lea.hbm %s3284_s3, 8192 }
  0x5e   : > { %p2207_p8 = scmp.ne.s32.totalorder %s3284_s3, %s2206_s7  ;;  %p2213_p11 = scmp.lt.u32.totalorder %s2206_s7, %s3284_s3 }
  0x60   : > { %p2209_p2 = pnand %p2207_p8, %p2180_p13 }
  0x62   : > { %p2210_p3 = pneg %p2209_p2 }
  0x64   : > { %p2215_p1 = pnand %p2213_p11, %p2210_p3 }
  0x66   : > { %2218 = shalt.err (!%p2215_p1)
}
  0x67   : > { %s2219_s8 = scalar_lea.vmem %s2491_s26, 8192  ;;  %p2227_p9 = scmp.lt.s32.totalorder %s2491_s26, %s2491_s26 }
  0x68   : > { %p2220_p6 = scmp.ne.s32.totalorder %s2491_s26, %s2219_s8  ;;  %p2228_p12 = scmp.lt.s32.totalorder %s2219_s8, %s2219_s8 }
  0x6a   : > { %p2222_p4 = pnand %p2220_p6, %p2180_p13  ;;  %p2229_p10 = por %p2228_p12, %p2227_p9 }
  0x6c   : > { %p2223_p7 = pneg %p2222_p4 }
  0x6e   : > { %p2230_p0 = pnand %p2229_p10, %p2223_p7 }
  0x70   : > { %2233 = shalt.err (!%p2230_p0)
}
  0x71   : > { %2048 = dma.hbm_to_vmem [thread:$0]  (!%p2487_p5), %s3284_s3, 8192, %s2491_s26, [#allocation9], %s2325_s10, %s2325_s10, %s2326_s11  }
  0x72   : > { %p3313_p8 = scmp.ne.s32.totalorder %s3311_s28, 0 }
  0x74   : > { %252 = sbr.rel (%p3313_p8) target bundleno = 1296 (0x510), region = 36 }
  0x7b   : > { %p3314_p13 = scmp.eq.s32.totalorder %s2462_s23, 0 }
  0x7d   : > { %2285 = dma.done.wait (%p3314_p13), [#allocation3], 8192   ;;  %p3315_p2 = pmov %p3314_p13 }
  0x7e   : > { %s258_s30 = sand.u32 1, %s2462_s23   ;;  %s260_s13 = sand.u32 1, %s2306_s16  }
  0x7f   : > { %2287 = vsyncadd (%p3315_p2), [#allocation3], 4294959104  ;;  %s1791_s22 = sshll.u32 %s260_s13, 9  ;;  %s259_s14 = scalar_lea.sflag [#allocation6], %s258_s30 }
  0x80   : > { %s2586_s25 = scalar_lea.vmem [#allocation5], %s1791_s22  ;;  %p3316_p3 = scmp.ne.s32.totalorder %s3310_s24, 0 }
  0x82   : > { %2289 = dma.done.wait (%p3316_p3), %s259_s14, 16384  }
  0x83   : > { %2291 = vsyncadd (%p3316_p3), %s259_s14, 4294950912  ;;  %s2592_s10 = scalar_lea.vmem [#allocation7], %s1791_s22  ;;  %p3317_p5 = pmov %p3315_p2 }
  0x84   : > { %p3318_p11 = pmov %p3315_p2 }
  0x85   : > { %2293 = dma.done.wait (%p3317_p5), [#allocation9], 8192  }
  0x86   : > { %2295 = vsyncadd (%p3318_p11), [#allocation9], 4294959104  ;;  %v368_v0 = vld [vmem:[%s2586_s25 + $0x8] sm:$0xff]  ;;  %v370_v1 = vld [vmem:[%s2586_s25 + $0x18] sm:$0xff]  ;;  %p1794_p1 = scmp.ne.s32.totalorder %s2314_s18, 0 }
  0x87   : > { %v367_v2 = vld [vmem:[%s2586_s25] sm:$0xff]  ;;  %v1802_v3 = vpack.c.bf16 %v370_v1, %v368_v0  ;;  %v369_v4 = vld [vmem:[%s2586_s25 + $0x10] sm:$0xff]  ;;  %v372_v5 = vld [vmem:[%s2586_s25 + $0x28] sm:$0xff] }
  0x88   : > { %v374_v6 = vld [vmem:[%s2586_s25 + $0x38] sm:$0xff]  ;;  %v1804_v7 = vpack.c.bf16 %v369_v4, %v367_v2  ;;  %v371_v9 = vld [vmem:[%s2586_s25 + $0x20] sm:$0xff]  ;;  %v373_v10 = vld [vmem:[%s2586_s25 + $0x30] sm:$0xff] }
  0x89   : > { %v1806_v8 = vpack.c.bf16 %v374_v6, %v372_v5  ;;  %v376_v11 = vld [vmem:[%s2586_s25 + $0x48] sm:$0xff]  ;;  %1803 = vmatprep.subr.bf16.mxu0 %v1802_v3  ;;  %v378_v12 = vld [vmem:[%s2586_s25 + $0x58] sm:$0xff]  ;;  %v1808_v13 = vpack.c.bf16 %v373_v10, %v371_v9  ;;  %v375_v15 = vld [vmem:[%s2586_s25 + $0x40] sm:$0xff] }
  0x8a   : > { %1805 = vmatpush1.bf16.msra.mxu0 %v1804_v7  ;;  %v1810_v14 = vpack.c.bf16 %v378_v12, %v376_v11  ;;  %v377_v16 = vld [vmem:[%s2586_s25 + $0x50] sm:$0xff]  ;;  %v380_v17 = vld [vmem:[%s2586_s25 + $0x68] sm:$0xff]  ;;  %v382_v18 = vld [vmem:[%s2586_s25 + $0x78] sm:$0xff] }
  0x8b   : > { %1807 = vmatprep.subr.bf16.mxu0 %v1806_v8  ;;  %v1812_v19 = vpack.c.bf16 %v377_v16, %v375_v15  ;;  %v1814_v20 = vpack.c.bf16 %v382_v18, %v380_v17  ;;  %v379_v21 = vld [vmem:[%s2586_s25 + $0x60] sm:$0xff]  ;;  %v381_v22 = vld [vmem:[%s2586_s25 + $0x70] sm:$0xff]  ;;  %v384_v23 = vld [vmem:[%s2586_s25 + $0x88] sm:$0xff] }
  0x8c   : > { %v386_v24 = vld [vmem:[%s2586_s25 + $0x98] sm:$0xff]  ;;  %v1816_v25 = vpack.c.bf16 %v381_v22, %v379_v21  ;;  %v383_v27 = vld [vmem:[%s2586_s25 + $0x80] sm:$0xff]  ;;  %v385_v28 = vld [vmem:[%s2586_s25 + $0x90] sm:$0xff] }
  0x8d   : > { %v1818_v26 = vpack.c.bf16 %v386_v24, %v384_v23  ;;  %v388_v29 = vld [vmem:[%s2586_s25 + $0xa8] sm:$0xff]  ;;  %v390_v30 = vld [vmem:[%s2586_s25 + $0xb8] sm:$0xff]  ;;  %v1820_v31 = vpack.c.bf16 %v385_v28, %v383_v27  ;;  %v387_v33 = vld [vmem:[%s2586_s25 + $0xa0] sm:$0xff] }
  0x8e   : > { %1809 = vmatpush1.bf16.msra.mxu0 %v1808_v13  ;;  %v1822_v32 = vpack.c.bf16 %v390_v30, %v388_v29  ;;  %v389_v34 = vld [vmem:[%s2586_s25 + $0xb0] sm:$0xff]  ;;  %v392_v35 = vld [vmem:[%s2586_s25 + $0xc8] sm:$0xff]  ;;  %v394_v36 = vld [vmem:[%s2586_s25 + $0xd8] sm:$0xff] }
  0x8f   : > { %1811 = vmatprep.subr.bf16.mxu0 %v1810_v14  ;;  %v1824_v37 = vpack.c.bf16 %v389_v34, %v387_v33  ;;  %v1826_v38 = vpack.c.bf16 %v394_v36, %v392_v35  ;;  %v391_v39 = vld [vmem:[%s2586_s25 + $0xc0] sm:$0xff]  ;;  %v393_v40 = vld [vmem:[%s2586_s25 + $0xd0] sm:$0xff]  ;;  %v2626_v41 = vld [vmem:[#allocation2 + $0x8] sm:$0xff] }
  0x90   : > { %v396_v42 = vld [vmem:[%s2586_s25 + $0xe8] sm:$0xff]  ;;  %v398_v43 = vld [vmem:[%s2586_s25 + $0xf8] sm:$0xff]  ;;  %495 = vmatprep.mubr.f32.mxu0 %v2626_v41  ;;  %v1828_v44 = vpack.c.bf16 %v393_v40, %v391_v39  ;;  %v395_v46 = vld [vmem:[%s2586_s25 + $0xe0] sm:$0xff] }
  0x91   : > { %v1830_v45 = vpack.c.bf16 %v398_v43, %v396_v42  ;;  %v397_v47 = vld [vmem:[%s2586_s25 + $0xf0] sm:$0xff]  ;;  %v400_v48 = vld [vmem:[%s2586_s25 + $0x108] sm:$0xff]  ;;  %v402_v49 = vld [vmem:[%s2586_s25 + $0x118] sm:$0xff] }
  0x92   : > { %1813 = vmatpush1.bf16.msra.mxu0 %v1812_v19  ;;  %v1832_v50 = vpack.c.bf16 %v397_v47, %v395_v46  ;;  %v1834_v51 = vpack.c.bf16 %v402_v49, %v400_v48  ;;  %v399_v52 = vld [vmem:[%s2586_s25 + $0x100] sm:$0xff]  ;;  %v401_v53 = vld [vmem:[%s2586_s25 + $0x110] sm:$0xff]  ;;  %v404_v54 = vld [vmem:[%s2586_s25 + $0x128] sm:$0xff] }
  0x93   : > { %1815 = vmatprep.subr.bf16.mxu0 %v1814_v20  ;;  %v406_v55 = vld [vmem:[%s2586_s25 + $0x138] sm:$0xff]  ;;  %v1836_v56 = vpack.c.bf16 %v401_v53, %v399_v52  ;;  %v403_v58 = vld [vmem:[%s2586_s25 + $0x120] sm:$0xff]  ;;  %v405_v59 = vld [vmem:[%s2586_s25 + $0x130] sm:$0xff] }
  0x94   : > { %v1838_v57 = vpack.c.bf16 %v406_v55, %v404_v54  ;;  %v408_v60 = vld [vmem:[%s2586_s25 + $0x148] sm:$0xff]  ;;  %v410_v61 = vld [vmem:[%s2586_s25 + $0x158] sm:$0xff]  ;;  %v1840_v62 = vpack.c.bf16 %v405_v59, %v403_v58  ;;  %v407_v0 = vld [vmem:[%s2586_s25 + $0x140] sm:$0xff] }
  0x95   : > { %v1842_v63 = vpack.c.bf16 %v410_v61, %v408_v60  ;;  %v409_v1 = vld [vmem:[%s2586_s25 + $0x150] sm:$0xff]  ;;  %v412_v2 = vld [vmem:[%s2586_s25 + $0x168] sm:$0xff]  ;;  %v414_v3 = vld [vmem:[%s2586_s25 + $0x178] sm:$0xff] }
  0x96   : > { %1817 = vmatpush1.bf16.msra.mxu0 %v1816_v25  ;;  %v1844_v4 = vpack.c.bf16 %v409_v1, %v407_v0  ;;  %v1846_v5 = vpack.c.bf16 %v414_v3, %v412_v2  ;;  %v411_v6 = vld [vmem:[%s2586_s25 + $0x160] sm:$0xff]  ;;  %v413_v7 = vld [vmem:[%s2586_s25 + $0x170] sm:$0xff]  ;;  %v416_v8 = vld [vmem:[%s2586_s25 + $0x188] sm:$0xff] }
  0x97   : > { %1819 = vmatprep.subr.bf16.mxu0 %v1818_v26  ;;  %v418_v9 = vld [vmem:[%s2586_s25 + $0x198] sm:$0xff]  ;;  %v1848_v10 = vpack.c.bf16 %v413_v7, %v411_v6  ;;  %v415_v12 = vld [vmem:[%s2586_s25 + $0x180] sm:$0xff]  ;;  %v417_v13 = vld [vmem:[%s2586_s25 + $0x190] sm:$0xff] }
  0x98   : > { %v1850_v11 = vpack.c.bf16 %v418_v9, %v416_v8  ;;  %v420_v14 = vld [vmem:[%s2586_s25 + $0x1a8] sm:$0xff]  ;;  %v422_v15 = vld [vmem:[%s2586_s25 + $0x1b8] sm:$0xff]  ;;  %v1852_v16 = vpack.c.bf16 %v417_v13, %v415_v12  ;;  %v419_v18 = vld [vmem:[%s2586_s25 + $0x1a0] sm:$0xff] }
  0x99   : > { %v1854_v17 = vpack.c.bf16 %v422_v15, %v420_v14  ;;  %v421_v19 = vld [vmem:[%s2586_s25 + $0x1b0] sm:$0xff]  ;;  %v424_v20 = vld [vmem:[%s2586_s25 + $0x1c8] sm:$0xff]  ;;  %v426_v21 = vld [vmem:[%s2586_s25 + $0x1d8] sm:$0xff] }
  0x9a   : > { %1821 = vmatpush1.bf16.msra.mxu0 %v1820_v31  ;;  %v1856_v22 = vpack.c.bf16 %v421_v19, %v419_v18  ;;  %v1858_v23 = vpack.c.bf16 %v426_v21, %v424_v20  ;;  %v423_v24 = vld [vmem:[%s2586_s25 + $0x1c0] sm:$0xff]  ;;  %v425_v25 = vld [vmem:[%s2586_s25 + $0x1d0] sm:$0xff]  ;;  %v428_v26 = vld [vmem:[%s2586_s25 + $0x1e8] sm:$0xff] }
  0x9b   : > { %1823 = vmatprep.subr.bf16.mxu0 %v1822_v32  ;;  %v430_v27 = vld [vmem:[%s2586_s25 + $0x1f8] sm:$0xff]  ;;  %v1860_v28 = vpack.c.bf16 %v425_v25, %v423_v24  ;;  %v427_v30 = vld [vmem:[%s2586_s25 + $0x1e0] sm:$0xff]  ;;  %v429_v31 = vld [vmem:[%s2586_s25 + $0x1f0] sm:$0xff] }
  0x9c   : > { %v1862_v29 = vpack.c.bf16 %v430_v27, %v428_v26  ;;  %v1864_v32 = vpack.c.bf16 %v429_v31, %v427_v30  ;;  %v2665_v33 = vld [vmem:[#allocation2] sm:$0xff]  ;;  %v2667_v34 = vld [vmem:[#allocation2 + $0x18] sm:$0xff]  ;;  %v2671_v35 = vld [vmem:[#allocation2 + $0x10] sm:$0xff] }
  0x9d   : > { %v2673_v36 = vld [vmem:[#allocation2 + $0x28] sm:$0xff]  ;;  %v2683_v39 = vld [vmem:[#allocation2 + $0x30] sm:$0xff]  ;;  %v2689_v42 = vld [vmem:[#allocation2 + $0x40] sm:$0xff] }
  0x9e   : > { %1825 = vmatpush1.bf16.msra.mxu0 %v1824_v37  ;;  %v2677_v37 = vld [vmem:[#allocation2 + $0x20] sm:$0xff]  ;;  %v2685_v40 = vld [vmem:[#allocation2 + $0x48] sm:$0xff]  ;;  %v2691_v43 = vld [vmem:[#allocation2 + $0x58] sm:$0xff] }
  0x9f   : > { %1827 = vmatprep.subr.bf16.mxu0 %v1826_v38  ;;  %v2679_v38 = vld [vmem:[#allocation2 + $0x38] sm:$0xff]  ;;  %v2701_v46 = vld [vmem:[#allocation2 + $0x60] sm:$0xff]  ;;  %v2707_v48 = vld [vmem:[#allocation2 + $0x70] sm:$0xff] }
  0xa0   : > { %v2703_v47 = vld [vmem:[#allocation2 + $0x78] sm:$0xff]  ;;  %v2709_v49 = vld [vmem:[#allocation2 + $0x88] sm:$0xff]  ;;  %v2719_v52 = vld [vmem:[#allocation2 + $0x90] sm:$0xff] }
  0xa1   : > { %v2721_v53 = vld [vmem:[#allocation2 + $0xa8] sm:$0xff]  ;;  %v2725_v54 = vld [vmem:[#allocation2 + $0xa0] sm:$0xff]  ;;  %v2727_v55 = vld [vmem:[#allocation2 + $0xb8] sm:$0xff] }
  0xa2   : > { %1829 = vmatpush1.bf16.msra.mxu0 %v1828_v44  ;;  %v2695_v44 = vld [vmem:[#allocation2 + $0x50] sm:$0xff]  ;;  %v2737_v58 = vld [vmem:[#allocation2 + $0xc0] sm:$0xff]  ;;  %v2739_v59 = vld [vmem:[#allocation2 + $0xd8] sm:$0xff] }
  0xa3   : > { %1831 = vmatprep.subr.bf16.mxu0 %v1830_v45  ;;  %v2697_v45 = vld [vmem:[#allocation2 + $0x68] sm:$0xff]  ;;  %3321 = vst [vmem:[#allocation17_spill] sm:$0xff] %v2737_v58  ;;  %3322 = vst [vmem:[#allocation18_spill] sm:$0xff] %v2739_v59  ;;  %v2743_v60 = vld [vmem:[#allocation2 + $0xd0] sm:$0xff] }
  0xa4   : > { %3323 = vst [vmem:[#allocation19_spill] sm:$0xff] %v2743_v60  ;;  %v2745_v61 = vld [vmem:[#allocation2 + $0xe8] sm:$0xff]  ;;  %v2755_v0 = vld [vmem:[#allocation2 + $0xf0] sm:$0xff]  ;;  %v2761_v2 = vld [vmem:[#allocation2 + $0x100] sm:$0xff] }
  0xa5   : > { %3324 = vst [vmem:[#allocation20_spill] sm:$0xff] %v2745_v61  ;;  %3327 = vst [vmem:[#allocation23_spill] sm:$0xff] %v2755_v0  ;;  %v2757_v1 = vld [vmem:[#allocation2 + $0x108] sm:$0xff]  ;;  %v2763_v3 = vld [vmem:[#allocation2 + $0x118] sm:$0xff] }
  0xa6   : > { %1833 = vmatpush1.bf16.msra.mxu0 %v1832_v50  ;;  %v2713_v50 = vld [vmem:[#allocation2 + $0x80] sm:$0xff]  ;;  %v2775_v7 = vld [vmem:[#allocation2 + $0x138] sm:$0xff]  ;;  %v2779_v8 = vld [vmem:[#allocation2 + $0x130] sm:$0xff] }
  0xa7   : > { %1835 = vmatprep.subr.bf16.mxu0 %v1834_v51  ;;  %v2715_v51 = vld [vmem:[#allocation2 + $0x98] sm:$0xff]  ;;  %v2773_v6 = vld [vmem:[#allocation2 + $0x120] sm:$0xff]  ;;  %v2781_v9 = vld [vmem:[#allocation2 + $0x148] sm:$0xff] }
  0xa8   : > { %v2791_v12 = vld [vmem:[#allocation2 + $0x150] sm:$0xff]  ;;  %v2793_v13 = vld [vmem:[#allocation2 + $0x168] sm:$0xff]  ;;  %v2797_v14 = vld [vmem:[#allocation2 + $0x160] sm:$0xff] }
  0xa9   : > { %v2799_v15 = vld [vmem:[#allocation2 + $0x178] sm:$0xff]  ;;  %v2809_v18 = vld [vmem:[#allocation2 + $0x180] sm:$0xff]  ;;  %v2815_v20 = vld [vmem:[#allocation2 + $0x190] sm:$0xff] }
  0xaa   : > { %1837 = vmatpush1.bf16.msra.mxu0 %v1836_v56  ;;  %v2731_v56 = vld [vmem:[#allocation2 + $0xb0] sm:$0xff]  ;;  %v2811_v19 = vld [vmem:[#allocation2 + $0x198] sm:$0xff]  ;;  %v2817_v21 = vld [vmem:[#allocation2 + $0x1a8] sm:$0xff] }
  0xab   : > { %1839 = vmatprep.subr.bf16.mxu0 %v1838_v57  ;;  %3319 = vst [vmem:[#allocation15_spill] sm:$0xff] %v2731_v56  ;;  %v2733_v57 = vld [vmem:[#allocation2 + $0xc8] sm:$0xff]  ;;  %v2827_v24 = vld [vmem:[#allocation2 + $0x1b0] sm:$0xff]  ;;  %v2833_v26 = vld [vmem:[#allocation2 + $0x1c0] sm:$0xff] }
  0xac   : > { %3320 = vst [vmem:[#allocation16_spill] sm:$0xff] %v2733_v57  ;;  %3329 = vst [vmem:[#allocation25_spill] sm:$0xff] %v2827_v24  ;;  %v2829_v25 = vld [vmem:[#allocation2 + $0x1c8] sm:$0xff]  ;;  %v2835_v27 = vld [vmem:[#allocation2 + $0x1d8] sm:$0xff] }
  0xad   : > { %3330 = vst [vmem:[#allocation26_spill] sm:$0xff] %v2829_v25  ;;  %3331 = vst [vmem:[#allocation27_spill] sm:$0xff] %v2833_v26  ;;  %v2845_v30 = vld [vmem:[#allocation2 + $0x1e0] sm:$0xff]  ;;  %v2847_v31 = vld [vmem:[#allocation2 + $0x1f8] sm:$0xff] }
  0xae   : > { %1841 = vmatpush1.bf16.msra.mxu0 %v1840_v62  ;;  %v2749_v62 = vld [vmem:[#allocation2 + $0xe0] sm:$0xff]  ;;  %3332 = vst [vmem:[#allocation28_spill] sm:$0xff] %v2835_v27  ;;  %3335 = vst [vmem:[#allocation31_spill] sm:$0xff] %v2845_v30 }
  0xaf   : > { %1843 = vmatprep.subr.bf16.mxu0 %v1842_v63  ;;  %3325 = vst [vmem:[#allocation21_spill] sm:$0xff] %v2749_v62  ;;  %v2751_v63 = vld [vmem:[#allocation2 + $0xf8] sm:$0xff]  ;;  %3336 = vst [vmem:[#allocation32_spill] sm:$0xff] %v2847_v31 }
  0xb0   : > { %3326 = vst [vmem:[#allocation22_spill] sm:$0xff] %v2751_v63 }
  0xb2   : > { %1845 = vmatpush1.bf16.msra.mxu0 %v1844_v4  ;;  %v2767_v4 = vld [vmem:[#allocation2 + $0x110] sm:$0xff] }
  0xb3   : > { %1847 = vmatprep.subr.bf16.mxu0 %v1846_v5  ;;  %v2769_v5 = vld [vmem:[#allocation2 + $0x128] sm:$0xff] }
  0xb6   : > { %1849 = vmatpush1.bf16.msra.mxu0 %v1848_v10  ;;  %v2785_v10 = vld [vmem:[#allocation2 + $0x140] sm:$0xff] }
  0xb7   : > { %1851 = vmatprep.subr.bf16.mxu0 %v1850_v11  ;;  %v2787_v11 = vld [vmem:[#allocation2 + $0x158] sm:$0xff] }
  0xba   : > { %1853 = vmatpush1.bf16.msra.mxu0 %v1852_v16  ;;  %v2803_v16 = vld [vmem:[#allocation2 + $0x170] sm:$0xff] }
  0xbb   : > { %1855 = vmatprep.subr.bf16.mxu0 %v1854_v17  ;;  %v2805_v17 = vld [vmem:[#allocation2 + $0x188] sm:$0xff] }
  0xbe   : > { %1857 = vmatpush1.bf16.msra.mxu0 %v1856_v22  ;;  %v2821_v22 = vld [vmem:[#allocation2 + $0x1a0] sm:$0xff] }
  0xbf   : > { %1859 = vmatprep.subr.bf16.mxu0 %v1858_v23  ;;  %v2823_v23 = vld [vmem:[#allocation2 + $0x1b8] sm:$0xff] }
  0xc0   : > { %3328 = vst [vmem:[#allocation24_spill] sm:$0xff] %v2823_v23 }
  0xc2   : > { %1861 = vmatpush1.bf16.msra.mxu0 %v1860_v28  ;;  %v2839_v28 = vld [vmem:[#allocation2 + $0x1d0] sm:$0xff] }
  0xc3   : > { %1863 = vmatprep.subr.bf16.mxu0 %v1862_v29  ;;  %3333 = vst [vmem:[#allocation29_spill] sm:$0xff] %v2839_v28  ;;  %v2841_v29 = vld [vmem:[#allocation2 + $0x1e8] sm:$0xff] }
  0xc4   : > { %3334 = vst [vmem:[#allocation30_spill] sm:$0xff] %v2841_v29 }
  0xc6   : > { %1865 = vmatpush1.bf16.msra.mxu0 %v1864_v32  ;;  %v2851_v32 = vld [vmem:[#allocation2 + $0x1f0] sm:$0xff] }
  0xc7   : > { %3337 = vst [vmem:[#allocation33_spill] sm:$0xff] %v2851_v32 }
  0xc9   : > { %496 = vmatmul.mubr.f32.vlgmr.msra.gmra.mrb[0].mxu0 %v2665_v33 }
  0xca   : > { %501 = vmatprep.mubr.f32.mxu0 %v2667_v34 }
  0xcd   : > { %502 = vmatmul.mubr.f32.gmra.mrb[2].mxu0 %v2671_v35 }
  0xce   : > { %507 = vmatprep.mubr.f32.mxu0 %v2673_v36 }
  0xd1   : > { %508 = vmatmul.mubr.f32.gmra.mrb[4].mxu0 %v2677_v37 }
  0xd2   : > { %513 = vmatprep.mubr.f32.mxu0 %v2679_v38 }
  0xd5   : > { %514 = vmatmul.mubr.f32.gmra.mrb[6].mxu0 %v2683_v39 }
  0xd6   : > { %519 = vmatprep.mubr.f32.mxu0 %v2685_v40 }
  0xd9   : > { %520 = vmatmul.mubr.f32.gmra.mrb[8].mxu0 %v2689_v42 }
  0xda   : > { %525 = vmatprep.mubr.f32.mxu0 %v2691_v43 }
  0xdd   : > { %526 = vmatmul.mubr.f32.gmra.mrb[10].mxu0 %v2695_v44 }
  0xde   : > { %531 = vmatprep.mubr.f32.mxu0 %v2697_v45 }
  0xe1   : > { %532 = vmatmul.mubr.f32.gmra.mrb[12].mxu0 %v2701_v46 }
  0xe2   : > { %537 = vmatprep.mubr.f32.mxu0 %v2703_v47 }
  0xe5   : > { %538 = vmatmul.mubr.f32.gmra.mrb[14].mxu0 %v2707_v48 }
  0xe6   : > { %543 = vmatprep.mubr.f32.mxu0 %v2709_v49 }
  0xe9   : > { %544 = vmatmul.mubr.f32.gmra.mrb[16].mxu0 %v2713_v50 }
  0xea   : > { %549 = vmatprep.mubr.f32.mxu0 %v2715_v51 }
  0xed   : > { %550 = vmatmul.mubr.f32.gmra.mrb[18].mxu0 %v2719_v52 }
  0xee   : > { %555 = vmatprep.mubr.f32.mxu0 %v2721_v53 }
  0xf1   : > { %556 = vmatmul.mubr.f32.gmra.mrb[20].mxu0 %v2725_v54 }
  0xf2   : > { %561 = vmatprep.mubr.f32.mxu0 %v2727_v55 }
  0xf5   : > { %562 = vmatmul.mubr.f32.gmra.mrb[22].mxu0 %v2731_v56 }
  0xf6   : > { %567 = vmatprep.mubr.f32.mxu0 %v2733_v57 }
  0xf9   : > { %568 = vmatmul.mubr.f32.gmra.mrb[24].mxu0 %v2737_v58 }
  0xfa   : > { %573 = vmatprep.mubr.f32.mxu0 %v2739_v59 }
  0xfd   : > { %574 = vmatmul.mubr.f32.gmra.mrb[26].mxu0 %v2743_v60 }
  0xfe   : > { %579 = vmatprep.mubr.f32.mxu0 %v2745_v61 }
 0x101   : > { %580 = vmatmul.mubr.f32.gmra.mrb[28].mxu0 %v2749_v62  ;;  %v689_v62 = vld [vmem:[%s2592_s10 + $0x8] sm:$0xff] }
 0x102   : > { %585 = vmatprep.mubr.f32.mxu0 %v2751_v63  ;;  %816 = vmatprep.mubr.f32.mxu1 %v689_v62 }
 0x105   : > { %586 = vmatmul.mubr.f32.gmra.mrb[30].mxu0 %v2755_v0 }
 0x106   : > { %591 = vmatprep.mubr.f32.mxu0 %v2757_v1 }
 0x109   : > { %592 = vmatmul.mubr.f32.gmra.mrb[32].mxu0 %v2761_v2 }
 0x10a   : > { %597 = vmatprep.mubr.f32.mxu0 %v2763_v3 }
 0x10d   : > { %598 = vmatmul.mubr.f32.gmra.mrb[34].mxu0 %v2767_v4 }
 0x10e   : > { %603 = vmatprep.mubr.f32.mxu0 %v2769_v5 }
 0x111   : > { %604 = vmatmul.mubr.f32.gmra.mrb[36].mxu0 %v2773_v6 }
 0x112   : > { %609 = vmatprep.mubr.f32.mxu0 %v2775_v7 }
 0x115   : > { %610 = vmatmul.mubr.f32.gmra.mrb[38].mxu0 %v2779_v8 }
 0x116   : > { %615 = vmatprep.mubr.f32.mxu0 %v2781_v9 }
 0x119   : > { %616 = vmatmul.mubr.f32.gmra.mrb[40].mxu0 %v2785_v10 }
 0x11a   : > { %621 = vmatprep.mubr.f32.mxu0 %v2787_v11 }
 0x11d   : > { %622 = vmatmul.mubr.f32.gmra.mrb[42].mxu0 %v2791_v12 }
 0x11e   : > { %627 = vmatprep.mubr.f32.mxu0 %v2793_v13 }
 0x121   : > { %628 = vmatmul.mubr.f32.gmra.mrb[44].mxu0 %v2797_v14 }
 0x122   : > { %633 = vmatprep.mubr.f32.mxu0 %v2799_v15 }
 0x125   : > { %634 = vmatmul.mubr.f32.gmra.mrb[46].mxu0 %v2803_v16 }
 0x126   : > { %639 = vmatprep.mubr.f32.mxu0 %v2805_v17 }
 0x129   : > { %640 = vmatmul.mubr.f32.gmra.mrb[48].mxu0 %v2809_v18 }
 0x12a   : > { %645 = vmatprep.mubr.f32.mxu0 %v2811_v19 }
 0x12d   : > { %646 = vmatmul.mubr.f32.gmra.mrb[50].mxu0 %v2815_v20 }
 0x12e   : > { %651 = vmatprep.mubr.f32.mxu0 %v2817_v21 }
 0x131   : > { %652 = vmatmul.mubr.f32.gmra.mrb[52].mxu0 %v2821_v22 }
 0x132   : > { %657 = vmatprep.mubr.f32.mxu0 %v2823_v23 }
 0x135   : > { %658 = vmatmul.mubr.f32.gmra.mrb[54].mxu0 %v2827_v24 }
 0x136   : > { %663 = vmatprep.mubr.f32.mxu0 %v2829_v25 }
 0x139   : > { %664 = vmatmul.mubr.f32.gmra.mrb[56].mxu0 %v2833_v26 }
 0x13a   : > { %669 = vmatprep.mubr.f32.mxu0 %v2835_v27 }
 0x13d   : > { %670 = vmatmul.mubr.f32.gmra.mrb[58].mxu0 %v2839_v28 }
 0x13e   : > { %675 = vmatprep.mubr.f32.mxu0 %v2841_v29 }
 0x141   : > { %676 = vmatmul.mubr.f32.gmra.mrb[60].mxu0 %v2845_v30 }
 0x142   : > { %681 = vmatprep.mubr.f32.mxu0 %v2847_v31 }
 0x145   : > { %682 = vmatmul.mubr.f32.gmra.mrb[62].mxu0 %v2851_v32 }
 0x146   : > { %1141 = vmatprep.mubr.f32.mxu0 (!%p1794_p1), %v2626_v41 }
 0x19c   : > { %v497_v0 = vpop.f32.mrb[0].mxu0 }
 0x19d   : > { %v499_v63 = vpop.f32.mrb[1].mxu0 }
 0x1a0   : > { %v503_v61 = vpop.f32.mrb[2].mxu0 }
 0x1a1   : > { %v1868_v28 = vpack.c.bf16 %v503_v61, %v497_v0  ;;  %v505_v60 = vpop.f32.mrb[3].mxu0 }
 0x1a2   : > { %v1866_v29 = vpack.c.bf16 %v505_v60, %v499_v63 }
 0x1a4   : > { %v509_v27 = vpop.f32.mrb[4].mxu0  ;;  %1867 = vmatprep.subr.bf16.mxu1 %v1866_v29 }
 0x1a5   : > { %v511_v59 = vpop.f32.mrb[5].mxu0  ;;  %1869 = vmatpush1.bf16.msra.mxu1 %v1868_v28 }
 0x1a8   : > { %v515_v26 = vpop.f32.mrb[6].mxu0 }
 0x1a9   : > { %v1872_v30 = vpack.c.bf16 %v515_v26, %v509_v27  ;;  %v517_v58 = vpop.f32.mrb[7].mxu0 }
 0x1aa   : > { %v1870_v31 = vpack.c.bf16 %v517_v58, %v511_v59 }
 0x1ac   : > { %v521_v25 = vpop.f32.mrb[8].mxu0  ;;  %1871 = vmatprep.subr.bf16.mxu1 %v1870_v31 }
 0x1ad   : > { %v523_v57 = vpop.f32.mrb[9].mxu0  ;;  %1873 = vmatpush1.bf16.msra.mxu1 %v1872_v30 }
 0x1b0   : > { %v527_v32 = vpop.f32.mrb[10].mxu0 }
 0x1b1   : > { %v1876_v24 = vpack.c.bf16 %v527_v32, %v521_v25  ;;  %v529_v56 = vpop.f32.mrb[11].mxu0 }
 0x1b2   : > { %v1874_v62 = vpack.c.bf16 %v529_v56, %v523_v57 }
 0x1b4   : > { %v533_v23 = vpop.f32.mrb[12].mxu0  ;;  %1875 = vmatprep.subr.bf16.mxu1 %v1874_v62 }
 0x1b5   : > { %v535_v61 = vpop.f32.mrb[13].mxu0  ;;  %1877 = vmatpush1.bf16.msra.mxu1 %v1876_v24 }
 0x1b8   : > { %v539_v60 = vpop.f32.mrb[14].mxu0 }
 0x1b9   : > { %v1880_v63 = vpack.c.bf16 %v539_v60, %v533_v23  ;;  %v541_v0 = vpop.f32.mrb[15].mxu0 }
 0x1ba   : > { %v1878_v28 = vpack.c.bf16 %v541_v0, %v535_v61 }
 0x1bc   : > { %v545_v29 = vpop.f32.mrb[16].mxu0  ;;  %1879 = vmatprep.subr.bf16.mxu1 %v1878_v28 }
 0x1bd   : > { %v547_v26 = vpop.f32.mrb[17].mxu0  ;;  %1881 = vmatpush1.bf16.msra.mxu1 %v1880_v63 }
 0x1c0   : > { %v551_v58 = vpop.f32.mrb[18].mxu0 }
 0x1c1   : > { %v1884_v59 = vpack.c.bf16 %v551_v58, %v545_v29  ;;  %v553_v27 = vpop.f32.mrb[19].mxu0 }
 0x1c2   : > { %v1882_v30 = vpack.c.bf16 %v553_v27, %v547_v26 }
 0x1c4   : > { %v557_v31 = vpop.f32.mrb[20].mxu0  ;;  %1883 = vmatprep.subr.bf16.mxu1 %v1882_v30 }
 0x1c5   : > { %v559_v25 = vpop.f32.mrb[21].mxu0  ;;  %1885 = vmatpush1.bf16.msra.mxu1 %v1884_v59 }
 0x1c8   : > { %v563_v56 = vpop.f32.mrb[22].mxu0 }
 0x1c9   : > { %v1888_v57 = vpack.c.bf16 %v563_v56, %v557_v31  ;;  %v565_v32 = vpop.f32.mrb[23].mxu0 }
 0x1ca   : > { %v1886_v24 = vpack.c.bf16 %v565_v32, %v559_v25 }
 0x1cc   : > { %v569_v62 = vpop.f32.mrb[24].mxu0  ;;  %1887 = vmatprep.subr.bf16.mxu1 %v1886_v24 }
 0x1cd   : > { %v571_v23 = vpop.f32.mrb[25].mxu0  ;;  %1889 = vmatpush1.bf16.msra.mxu1 %v1888_v57 }
 0x1d0   : > { %v575_v61 = vpop.f32.mrb[26].mxu0 }
 0x1d1   : > { %v1892_v60 = vpack.c.bf16 %v575_v61, %v569_v62  ;;  %v577_v0 = vpop.f32.mrb[27].mxu0 }
 0x1d2   : > { %v1890_v63 = vpack.c.bf16 %v577_v0, %v571_v23 }
 0x1d4   : > { %v581_v28 = vpop.f32.mrb[28].mxu0  ;;  %1891 = vmatprep.subr.bf16.mxu1 %v1890_v63 }
 0x1d5   : > { %v583_v29 = vpop.f32.mrb[29].mxu0  ;;  %1893 = vmatpush1.bf16.msra.mxu1 %v1892_v60 }
 0x1d8   : > { %v587_v26 = vpop.f32.mrb[30].mxu0 }
 0x1d9   : > { %v1896_v58 = vpack.c.bf16 %v587_v26, %v581_v28  ;;  %v589_v27 = vpop.f32.mrb[31].mxu0 }
 0x1da   : > { %v1894_v59 = vpack.c.bf16 %v589_v27, %v583_v29 }
 0x1dc   : > { %v593_v30 = vpop.f32.mrb[32].mxu0  ;;  %1895 = vmatprep.subr.bf16.mxu1 %v1894_v59 }
 0x1dd   : > { %v595_v31 = vpop.f32.mrb[33].mxu0  ;;  %1897 = vmatpush1.bf16.msra.mxu1 %v1896_v58 }
 0x1e0   : > { %v599_v25 = vpop.f32.mrb[34].mxu0 }
 0x1e1   : > { %v1900_v56 = vpack.c.bf16 %v599_v25, %v593_v30  ;;  %v601_v32 = vpop.f32.mrb[35].mxu0 }
 0x1e2   : > { %v1898_v57 = vpack.c.bf16 %v601_v32, %v595_v31 }
 0x1e4   : > { %v605_v24 = vpop.f32.mrb[36].mxu0  ;;  %1899 = vmatprep.subr.bf16.mxu1 %v1898_v57 }
 0x1e5   : > { %v607_v62 = vpop.f32.mrb[37].mxu0  ;;  %1901 = vmatpush1.bf16.msra.mxu1 %v1900_v56 }
 0x1e8   : > { %v611_v23 = vpop.f32.mrb[38].mxu0 }
 0x1e9   : > { %v1904_v61 = vpack.c.bf16 %v611_v23, %v605_v24  ;;  %v613_v0 = vpop.f32.mrb[39].mxu0 }
 0x1ea   : > { %v1902_v60 = vpack.c.bf16 %v613_v0, %v607_v62 }
 0x1ec   : > { %v617_v63 = vpop.f32.mrb[40].mxu0  ;;  %1903 = vmatprep.subr.bf16.mxu1 %v1902_v60 }
 0x1ed   : > { %v619_v28 = vpop.f32.mrb[41].mxu0  ;;  %1905 = vmatpush1.bf16.msra.mxu1 %v1904_v61 }
 0x1f0   : > { %v623_v29 = vpop.f32.mrb[42].mxu0 }
 0x1f1   : > { %v1908_v26 = vpack.c.bf16 %v623_v29, %v617_v63  ;;  %v625_v27 = vpop.f32.mrb[43].mxu0 }
 0x1f2   : > { %v1906_v58 = vpack.c.bf16 %v625_v27, %v619_v28 }
 0x1f4   : > { %v629_v59 = vpop.f32.mrb[44].mxu0  ;;  %1907 = vmatprep.subr.bf16.mxu1 %v1906_v58 }
 0x1f5   : > { %v631_v30 = vpop.f32.mrb[45].mxu0  ;;  %1909 = vmatpush1.bf16.msra.mxu1 %v1908_v26 }
 0x1f8   : > { %v635_v31 = vpop.f32.mrb[46].mxu0 }
 0x1f9   : > { %v1912_v25 = vpack.c.bf16 %v635_v31, %v629_v59  ;;  %v637_v32 = vpop.f32.mrb[47].mxu0 }
 0x1fa   : > { %v1910_v56 = vpack.c.bf16 %v637_v32, %v631_v30 }
 0x1fc   : > { %v641_v57 = vpop.f32.mrb[48].mxu0  ;;  %1911 = vmatprep.subr.bf16.mxu1 %v1910_v56 }
 0x1fd   : > { %v643_v24 = vpop.f32.mrb[49].mxu0  ;;  %1913 = vmatpush1.bf16.msra.mxu1 %v1912_v25 }
 0x200   : > { %v647_v62 = vpop.f32.mrb[50].mxu0 }
 0x201   : > { %v1916_v23 = vpack.c.bf16 %v647_v62, %v641_v57  ;;  %v649_v0 = vpop.f32.mrb[51].mxu0 }
 0x202   : > { %v1914_v61 = vpack.c.bf16 %v649_v0, %v643_v24 }
 0x204   : > { %v653_v60 = vpop.f32.mrb[52].mxu0  ;;  %1915 = vmatprep.subr.bf16.mxu1 %v1914_v61  ;;  %v688_v61 = vld [vmem:[%s2592_s10] sm:$0xff] }
 0x205   : > { %v655_v63 = vpop.f32.mrb[53].mxu0  ;;  %1917 = vmatpush1.bf16.msra.mxu1 %v1916_v23 }
 0x208   : > { %v659_v28 = vpop.f32.mrb[54].mxu0 }
 0x209   : > { %v1920_v29 = vpack.c.bf16 %v659_v28, %v653_v60  ;;  %v661_v27 = vpop.f32.mrb[55].mxu0  ;;  %v691_v60 = vld [vmem:[%s2592_s10 + $0x18] sm:$0xff]  ;;  %v693_v28 = vld [vmem:[%s2592_s10 + $0x28] sm:$0xff] }
 0x20a   : > { %v1918_v26 = vpack.c.bf16 %v661_v27, %v655_v63  ;;  %v690_v63 = vld [vmem:[%s2592_s10 + $0x10] sm:$0xff]  ;;  %v695_v27 = vld [vmem:[%s2592_s10 + $0x38] sm:$0xff] }
 0x20c   : > { %v665_v58 = vpop.f32.mrb[56].mxu0  ;;  %1919 = vmatprep.subr.bf16.mxu1 %v1918_v26  ;;  %v694_v26 = vld [vmem:[%s2592_s10 + $0x30] sm:$0xff] }
 0x20d   : > { %v667_v59 = vpop.f32.mrb[57].mxu0  ;;  %1921 = vmatpush1.bf16.msra.mxu1 %v1920_v29  ;;  %v692_v29 = vld [vmem:[%s2592_s10 + $0x20] sm:$0xff] }
 0x210   : > { %v671_v30 = vpop.f32.mrb[58].mxu0 }
 0x211   : > { %v1924_v31 = vpack.c.bf16 %v671_v30, %v665_v58  ;;  %v673_v25 = vpop.f32.mrb[59].mxu0  ;;  %v697_v58 = vld [vmem:[%s2592_s10 + $0x48] sm:$0xff]  ;;  %v699_v30 = vld [vmem:[%s2592_s10 + $0x58] sm:$0xff] }
 0x212   : > { %v1922_v32 = vpack.c.bf16 %v673_v25, %v667_v59  ;;  %v696_v59 = vld [vmem:[%s2592_s10 + $0x40] sm:$0xff]  ;;  %v701_v25 = vld [vmem:[%s2592_s10 + $0x68] sm:$0xff] }
 0x214   : > { %v677_v56 = vpop.f32.mrb[60].mxu0  ;;  %1923 = vmatprep.subr.bf16.mxu1 %v1922_v32  ;;  %v700_v32 = vld [vmem:[%s2592_s10 + $0x60] sm:$0xff] }
 0x215   : > { %v679_v57 = vpop.f32.mrb[61].mxu0  ;;  %1925 = vmatpush1.bf16.msra.mxu1 %v1924_v31  ;;  %v698_v31 = vld [vmem:[%s2592_s10 + $0x50] sm:$0xff] }
 0x218   : > { %v683_v24 = vpop.f32.mrb[62].mxu0 }
 0x219   : > { %v1928_v62 = vpack.c.bf16 %v683_v24, %v677_v56  ;;  %v685_v23 = vpop.f32.mrb[63].mxu0  ;;  %v703_v56 = vld [vmem:[%s2592_s10 + $0x78] sm:$0xff]  ;;  %v705_v24 = vld [vmem:[%s2592_s10 + $0x88] sm:$0xff] }
 0x21a   : > { %v1926_v0 = vpack.c.bf16 %v685_v23, %v679_v57  ;;  %v702_v57 = vld [vmem:[%s2592_s10 + $0x70] sm:$0xff]  ;;  %v707_v23 = vld [vmem:[%s2592_s10 + $0x98] sm:$0xff] }
 0x21c   : > { %1927 = vmatprep.subr.bf16.mxu1 %v1926_v0  ;;  %v706_v0 = vld [vmem:[%s2592_s10 + $0x90] sm:$0xff] }
 0x21d   : > { %1929 = vmatpush1.bf16.msra.mxu1 %v1928_v62  ;;  %v704_v62 = vld [vmem:[%s2592_s10 + $0x80] sm:$0xff] }
 0x220   : > { %817 = vmatmul.mubr.f32.vlgmr.msra.gmra.mrb[0].mxu1 %v688_v61  ;;  %v709_v61 = vld [vmem:[%s2592_s10 + $0xa8] sm:$0xff] }
 0x221   : > { %822 = vmatprep.mubr.f32.mxu1 %v691_v60  ;;  %v708_v60 = vld [vmem:[%s2592_s10 + $0xa0] sm:$0xff] }
 0x224   : > { %823 = vmatmul.mubr.f32.gmra.mrb[2].mxu1 %v690_v63  ;;  %v711_v63 = vld [vmem:[%s2592_s10 + $0xb8] sm:$0xff] }
 0x225   : > { %828 = vmatprep.mubr.f32.mxu1 %v693_v28  ;;  %v710_v28 = vld [vmem:[%s2592_s10 + $0xb0] sm:$0xff] }
 0x228   : > { %829 = vmatmul.mubr.f32.gmra.mrb[4].mxu1 %v692_v29  ;;  %v713_v29 = vld [vmem:[%s2592_s10 + $0xc8] sm:$0xff] }
 0x229   : > { %834 = vmatprep.mubr.f32.mxu1 %v695_v27  ;;  %v712_v27 = vld [vmem:[%s2592_s10 + $0xc0] sm:$0xff] }
 0x22c   : > { %835 = vmatmul.mubr.f32.gmra.mrb[6].mxu1 %v694_v26  ;;  %v715_v26 = vld [vmem:[%s2592_s10 + $0xd8] sm:$0xff] }
 0x22d   : > { %840 = vmatprep.mubr.f32.mxu1 %v697_v58  ;;  %v714_v58 = vld [vmem:[%s2592_s10 + $0xd0] sm:$0xff] }
 0x230   : > { %841 = vmatmul.mubr.f32.gmra.mrb[8].mxu1 %v696_v59  ;;  %v717_v59 = vld [vmem:[%s2592_s10 + $0xe8] sm:$0xff] }
 0x231   : > { %846 = vmatprep.mubr.f32.mxu1 %v699_v30  ;;  %v716_v30 = vld [vmem:[%s2592_s10 + $0xe0] sm:$0xff] }
 0x234   : > { %847 = vmatmul.mubr.f32.gmra.mrb[10].mxu1 %v698_v31  ;;  %v719_v31 = vld [vmem:[%s2592_s10 + $0xf8] sm:$0xff] }
 0x235   : > { %852 = vmatprep.mubr.f32.mxu1 %v701_v25  ;;  %v718_v25 = vld [vmem:[%s2592_s10 + $0xf0] sm:$0xff] }
 0x238   : > { %853 = vmatmul.mubr.f32.gmra.mrb[12].mxu1 %v700_v32  ;;  %v721_v32 = vld [vmem:[%s2592_s10 + $0x108] sm:$0xff] }
 0x239   : > { %858 = vmatprep.mubr.f32.mxu1 %v703_v56  ;;  %v720_v56 = vld [vmem:[%s2592_s10 + $0x100] sm:$0xff] }
 0x23c   : > { %859 = vmatmul.mubr.f32.gmra.mrb[14].mxu1 %v702_v57  ;;  %v723_v57 = vld [vmem:[%s2592_s10 + $0x118] sm:$0xff] }
 0x23d   : > { %864 = vmatprep.mubr.f32.mxu1 %v705_v24  ;;  %v722_v24 = vld [vmem:[%s2592_s10 + $0x110] sm:$0xff] }
 0x240   : > { %865 = vmatmul.mubr.f32.gmra.mrb[16].mxu1 %v704_v62  ;;  %v725_v62 = vld [vmem:[%s2592_s10 + $0x128] sm:$0xff] }
 0x241   : > { %870 = vmatprep.mubr.f32.mxu1 %v707_v23  ;;  %v724_v23 = vld [vmem:[%s2592_s10 + $0x120] sm:$0xff] }
 0x244   : > { %871 = vmatmul.mubr.f32.gmra.mrb[18].mxu1 %v706_v0  ;;  %v727_v0 = vld [vmem:[%s2592_s10 + $0x138] sm:$0xff] }
 0x245   : > { %876 = vmatprep.mubr.f32.mxu1 %v709_v61  ;;  %v726_v61 = vld [vmem:[%s2592_s10 + $0x130] sm:$0xff] }
 0x248   : > { %877 = vmatmul.mubr.f32.gmra.mrb[20].mxu1 %v708_v60  ;;  %v729_v60 = vld [vmem:[%s2592_s10 + $0x148] sm:$0xff] }
 0x249   : > { %882 = vmatprep.mubr.f32.mxu1 %v711_v63  ;;  %v728_v63 = vld [vmem:[%s2592_s10 + $0x140] sm:$0xff] }
 0x24c   : > { %883 = vmatmul.mubr.f32.gmra.mrb[22].mxu1 %v710_v28  ;;  %v731_v28 = vld [vmem:[%s2592_s10 + $0x158] sm:$0xff] }
 0x24d   : > { %888 = vmatprep.mubr.f32.mxu1 %v713_v29  ;;  %v730_v29 = vld [vmem:[%s2592_s10 + $0x150] sm:$0xff] }
 0x250   : > { %889 = vmatmul.mubr.f32.gmra.mrb[24].mxu1 %v712_v27  ;;  %v733_v27 = vld [vmem:[%s2592_s10 + $0x168] sm:$0xff] }
 0x251   : > { %894 = vmatprep.mubr.f32.mxu1 %v715_v26  ;;  %v732_v26 = vld [vmem:[%s2592_s10 + $0x160] sm:$0xff] }
 0x254   : > { %895 = vmatmul.mubr.f32.gmra.mrb[26].mxu1 %v714_v58  ;;  %v735_v58 = vld [vmem:[%s2592_s10 + $0x178] sm:$0xff] }
 0x255   : > { %900 = vmatprep.mubr.f32.mxu1 %v717_v59  ;;  %v734_v59 = vld [vmem:[%s2592_s10 + $0x170] sm:$0xff] }
 0x258   : > { %901 = vmatmul.mubr.f32.gmra.mrb[28].mxu1 %v716_v30  ;;  %v737_v30 = vld [vmem:[%s2592_s10 + $0x188] sm:$0xff] }
 0x259   : > { %906 = vmatprep.mubr.f32.mxu1 %v719_v31  ;;  %v736_v31 = vld [vmem:[%s2592_s10 + $0x180] sm:$0xff] }
 0x25c   : > { %907 = vmatmul.mubr.f32.gmra.mrb[30].mxu1 %v718_v25  ;;  %v739_v25 = vld [vmem:[%s2592_s10 + $0x198] sm:$0xff] }
 0x25d   : > { %912 = vmatprep.mubr.f32.mxu1 %v721_v32  ;;  %v738_v32 = vld [vmem:[%s2592_s10 + $0x190] sm:$0xff] }
 0x260   : > { %913 = vmatmul.mubr.f32.gmra.mrb[32].mxu1 %v720_v56  ;;  %v741_v56 = vld [vmem:[%s2592_s10 + $0x1a8] sm:$0xff] }
 0x261   : > { %918 = vmatprep.mubr.f32.mxu1 %v723_v57  ;;  %v740_v57 = vld [vmem:[%s2592_s10 + $0x1a0] sm:$0xff] }
 0x264   : > { %919 = vmatmul.mubr.f32.gmra.mrb[34].mxu1 %v722_v24  ;;  %v743_v24 = vld [vmem:[%s2592_s10 + $0x1b8] sm:$0xff] }
 0x265   : > { %924 = vmatprep.mubr.f32.mxu1 %v725_v62  ;;  %v742_v62 = vld [vmem:[%s2592_s10 + $0x1b0] sm:$0xff] }
 0x268   : > { %925 = vmatmul.mubr.f32.gmra.mrb[36].mxu1 %v724_v23  ;;  %v745_v23 = vld [vmem:[%s2592_s10 + $0x1c8] sm:$0xff] }
 0x269   : > { %930 = vmatprep.mubr.f32.mxu1 %v727_v0  ;;  %v744_v0 = vld [vmem:[%s2592_s10 + $0x1c0] sm:$0xff] }
 0x26c   : > { %931 = vmatmul.mubr.f32.gmra.mrb[38].mxu1 %v726_v61  ;;  %v747_v61 = vld [vmem:[%s2592_s10 + $0x1d8] sm:$0xff] }
 0x26d   : > { %936 = vmatprep.mubr.f32.mxu1 %v729_v60  ;;  %v746_v60 = vld [vmem:[%s2592_s10 + $0x1d0] sm:$0xff] }
 0x270   : > { %937 = vmatmul.mubr.f32.gmra.mrb[40].mxu1 %v728_v63  ;;  %v749_v63 = vld [vmem:[%s2592_s10 + $0x1e8] sm:$0xff] }
 0x271   : > { %942 = vmatprep.mubr.f32.mxu1 %v731_v28  ;;  %v748_v28 = vld [vmem:[%s2592_s10 + $0x1e0] sm:$0xff] }
 0x274   : > { %943 = vmatmul.mubr.f32.gmra.mrb[42].mxu1 %v730_v29  ;;  %v751_v29 = vld [vmem:[%s2592_s10 + $0x1f8] sm:$0xff] }
 0x275   : > { %948 = vmatprep.mubr.f32.mxu1 %v733_v27  ;;  %v750_v27 = vld [vmem:[%s2592_s10 + $0x1f0] sm:$0xff] }
 0x278   : > { %949 = vmatmul.mubr.f32.gmra.mrb[44].mxu1 %v732_v26 }
 0x279   : > { %954 = vmatprep.mubr.f32.mxu1 %v735_v58 }
 0x27c   : > { %955 = vmatmul.mubr.f32.gmra.mrb[46].mxu1 %v734_v59 }
 0x27d   : > { %960 = vmatprep.mubr.f32.mxu1 %v737_v30 }
 0x280   : > { %961 = vmatmul.mubr.f32.gmra.mrb[48].mxu1 %v736_v31 }
 0x281   : > { %966 = vmatprep.mubr.f32.mxu1 %v739_v25 }
 0x284   : > { %967 = vmatmul.mubr.f32.gmra.mrb[50].mxu1 %v738_v32 }
 0x285   : > { %972 = vmatprep.mubr.f32.mxu1 %v741_v56 }
 0x288   : > { %973 = vmatmul.mubr.f32.gmra.mrb[52].mxu1 %v740_v57 }
 0x289   : > { %978 = vmatprep.mubr.f32.mxu1 %v743_v24 }
 0x28c   : > { %979 = vmatmul.mubr.f32.gmra.mrb[54].mxu1 %v742_v62 }
 0x28d   : > { %984 = vmatprep.mubr.f32.mxu1 %v745_v23 }
 0x290   : > { %985 = vmatmul.mubr.f32.gmra.mrb[56].mxu1 %v744_v0 }
 0x291   : > { %990 = vmatprep.mubr.f32.mxu1 %v747_v61 }
 0x294   : > { %991 = vmatmul.mubr.f32.gmra.mrb[58].mxu1 %v746_v60 }
 0x295   : > { %996 = vmatprep.mubr.f32.mxu1 %v749_v63 }
 0x298   : > { %997 = vmatmul.mubr.f32.gmra.mrb[60].mxu1 %v748_v28 }
 0x299   : > { %1002 = vmatprep.mubr.f32.mxu1 %v751_v29 }
 0x29c   : > { %1003 = vmatmul.mubr.f32.gmra.mrb[62].mxu1 %v750_v27 }
 0x29d   : > { %1237 = vmatprep.mubr.f32.mxu1 (!%p1794_p1), %v2757_v1  ;;  %v1023_v1 = vld [vmem:[#allocation8 + $0x50] sm:$0xff] (!%p1794_p1) }
 0x2f3   : > { %v2918_v26 = vpop.f32.mrb[0].mxu1 }
 0x2f4   : > { %v2920_v58 = vpop.f32.mrb[1].mxu1 }
 0x2f7   : > { %v2922_v59 = vpop.f32.mrb[2].mxu1 }
 0x2f8   : > { %3338 = vst [vmem:[#allocation34_spill] sm:$0xff] %v2922_v59  ;;  %v2924_v30 = vpop.f32.mrb[3].mxu1  ;;  %v1021_v59 = vld [vmem:[#allocation8 + $0x40] sm:$0xff] (!%p1794_p1) }
 0x2f9   : > { %3339 = vst [vmem:[#allocation35_spill] sm:$0xff] %v2924_v30  ;;  %v1022_v30 = vld [vmem:[#allocation8 + $0x48] sm:$0xff] (!%p1794_p1) }
 0x2fb   : > { %v2926_v31 = vpop.f32.mrb[4].mxu1 }
 0x2fc   : > { %3340 = vst [vmem:[#allocation36_spill] sm:$0xff] %v2926_v31  ;;  %v2928_v25 = vpop.f32.mrb[5].mxu1 }
 0x2fd   : > { %3341 = vst [vmem:[#allocation37_spill] sm:$0xff] %v2928_v25 }
 0x2ff   : > { %v2930_v32 = vpop.f32.mrb[6].mxu1 }
 0x300   : > { %3342 = vst [vmem:[#allocation38_spill] sm:$0xff] %v2930_v32  ;;  %v2932_v56 = vpop.f32.mrb[7].mxu1 }
 0x301   : > { %3343 = vst [vmem:[#allocation39_spill] sm:$0xff] %v2932_v56 }
 0x303   : > { %v2934_v57 = vpop.f32.mrb[8].mxu1 }
 0x304   : > { %3344 = vst [vmem:[#allocation40_spill] sm:$0xff] %v2934_v57  ;;  %v2936_v24 = vpop.f32.mrb[9].mxu1 }
 0x305   : > { %3345 = vst [vmem:[#allocation41_spill] sm:$0xff] %v2936_v24 }
 0x307   : > { %v2938_v62 = vpop.f32.mrb[10].mxu1 }
 0x308   : > { %3346 = vst [vmem:[#allocation42_spill] sm:$0xff] %v2938_v62  ;;  %v2940_v23 = vpop.f32.mrb[11].mxu1 }
 0x309   : > { %3347 = vst [vmem:[#allocation43_spill] sm:$0xff] %v2940_v23 }
 0x30b   : > { %v2942_v0 = vpop.f32.mrb[12].mxu1 }
 0x30c   : > { %3348 = vst [vmem:[#allocation44_spill] sm:$0xff] %v2942_v0  ;;  %v2944_v61 = vpop.f32.mrb[13].mxu1 }
 0x30d   : > { %3349 = vst [vmem:[#allocation45_spill] sm:$0xff] %v2944_v61 }
 0x30f   : > { %v2946_v60 = vpop.f32.mrb[14].mxu1 }
 0x310   : > { %3350 = vst [vmem:[#allocation46_spill] sm:$0xff] %v2946_v60  ;;  %v2948_v63 = vpop.f32.mrb[15].mxu1 }
 0x311   : > { %3351 = vst [vmem:[#allocation47_spill] sm:$0xff] %v2948_v63 }
 0x313   : > { %v2950_v28 = vpop.f32.mrb[16].mxu1 }
 0x314   : > { %3352 = vst [vmem:[#allocation48_spill] sm:$0xff] %v2950_v28  ;;  %v2952_v29 = vpop.f32.mrb[17].mxu1 }
 0x315   : > { %3353 = vst [vmem:[#allocation49_spill] sm:$0xff] %v2952_v29 }
 0x317   : > { %v2954_v27 = vpop.f32.mrb[18].mxu1 }
 0x318   : > { %3354 = vst [vmem:[#allocation50_spill] sm:$0xff] %v2954_v27  ;;  %v2956_v57 = vpop.f32.mrb[19].mxu1 }
 0x319   : > { %3355 = vst [vmem:[#allocation51_spill] sm:$0xff] %v2956_v57 }
 0x31b   : > { %v2958_v24 = vpop.f32.mrb[20].mxu1 }
 0x31c   : > { %3356 = vst [vmem:[#allocation52_spill] sm:$0xff] %v2958_v24  ;;  %v2960_v62 = vpop.f32.mrb[21].mxu1 }
 0x31d   : > { %3357 = vst [vmem:[#allocation53_spill] sm:$0xff] %v2960_v62 }
 0x31f   : > { %v2962_v23 = vpop.f32.mrb[22].mxu1 }
 0x320   : > { %3358 = vst [vmem:[#allocation54_spill] sm:$0xff] %v2962_v23  ;;  %v2964_v0 = vpop.f32.mrb[23].mxu1 }
 0x321   : > { %3359 = vst [vmem:[#allocation55_spill] sm:$0xff] %v2964_v0 }
 0x323   : > { %v2966_v61 = vpop.f32.mrb[24].mxu1 }
 0x324   : > { %3360 = vst [vmem:[#allocation56_spill] sm:$0xff] %v2966_v61  ;;  %v2968_v60 = vpop.f32.mrb[25].mxu1 }
 0x325   : > { %3361 = vst [vmem:[#allocation57_spill] sm:$0xff] %v2968_v60 }
 0x327   : > { %v2970_v63 = vpop.f32.mrb[26].mxu1 }
 0x328   : > { %3362 = vst [vmem:[#allocation58_spill] sm:$0xff] %v2970_v63  ;;  %v2972_v28 = vpop.f32.mrb[27].mxu1 }
 0x329   : > { %3363 = vst [vmem:[#allocation59_spill] sm:$0xff] %v2972_v28 }
 0x32b   : > { %v2974_v29 = vpop.f32.mrb[28].mxu1 }
 0x32c   : > { %3364 = vst [vmem:[#allocation60_spill] sm:$0xff] %v2974_v29  ;;  %v2976_v27 = vpop.f32.mrb[29].mxu1 }
 0x32d   : > { %3365 = vst [vmem:[#allocation61_spill] sm:$0xff] %v2976_v27 }
 0x32f   : > { %v2978_v57 = vpop.f32.mrb[30].mxu1 }
 0x330   : > { %3366 = vst [vmem:[#allocation62_spill] sm:$0xff] %v2978_v57  ;;  %v2980_v24 = vpop.f32.mrb[31].mxu1 }
 0x331   : > { %3367 = vst [vmem:[#allocation63_spill] sm:$0xff] %v2980_v24 }
 0x333   : > { %v2982_v62 = vpop.f32.mrb[32].mxu1 }
 0x334   : > { %v2984_v23 = vpop.f32.mrb[33].mxu1 }
 0x335   : > { %3368 = vst [vmem:[#allocation64_spill] sm:$0xff] %v2984_v23  ;;  %v1032_v23 = vld [vmem:[#allocation8 + $0x98] sm:$0xff] (!%p1794_p1) }
 0x337   : > { %v2986_v0 = vpop.f32.mrb[34].mxu1 }
 0x338   : > { %3369 = vst [vmem:[#allocation65_spill] sm:$0xff] %v2986_v0  ;;  %v2988_v61 = vpop.f32.mrb[35].mxu1 }
 0x339   : > { %3370 = vst [vmem:[#allocation66_spill] sm:$0xff] %v2988_v61  ;;  %v1017_v61 = vld [vmem:[#allocation8 + $0x20] sm:$0xff] (!%p1794_p1) }
 0x33b   : > { %v2990_v60 = vpop.f32.mrb[36].mxu1 }
 0x33c   : > { %3371 = vst [vmem:[#allocation67_spill] sm:$0xff] %v2990_v60  ;;  %v2992_v63 = vpop.f32.mrb[37].mxu1 }
 0x33d   : > { %3372 = vst [vmem:[#allocation68_spill] sm:$0xff] %v2992_v63 }
 0x33f   : > { %v2994_v28 = vpop.f32.mrb[38].mxu1 }
 0x340   : > { %3373 = vst [vmem:[#allocation69_spill] sm:$0xff] %v2994_v28  ;;  %v2996_v29 = vpop.f32.mrb[39].mxu1 }
 0x341   : > { %3374 = vst [vmem:[#allocation70_spill] sm:$0xff] %v2996_v29 }
 0x343   : > { %v2998_v27 = vpop.f32.mrb[40].mxu1 }
 0x344   : > { %3375 = vst [vmem:[#allocation71_spill] sm:$0xff] %v2998_v27  ;;  %v3000_v57 = vpop.f32.mrb[41].mxu1 }
 0x345   : > { %3376 = vst [vmem:[#allocation72_spill] sm:$0xff] %v3000_v57 }
 0x347   : > { %v3002_v24 = vpop.f32.mrb[42].mxu1 }
 0x348   : > { %3377 = vst [vmem:[#allocation73_spill] sm:$0xff] %v3002_v24  ;;  %v3004_v56 = vpop.f32.mrb[43].mxu1 }
 0x349   : > { %3378 = vst [vmem:[#allocation74_spill] sm:$0xff] %v3004_v56 }
 0x34b   : > { %v3006_v32 = vpop.f32.mrb[44].mxu1 }
 0x34c   : > { %3379 = vst [vmem:[#allocation75_spill] sm:$0xff] %v3006_v32  ;;  %v3008_v25 = vpop.f32.mrb[45].mxu1 }
 0x34d   : > { %3380 = vst [vmem:[#allocation76_spill] sm:$0xff] %v3008_v25 }
 0x34f   : > { %v3010_v31 = vpop.f32.mrb[46].mxu1 }
 0x350   : > { %3381 = vst [vmem:[#allocation77_spill] sm:$0xff] %v3010_v31  ;;  %v3012_v60 = vpop.f32.mrb[47].mxu1 }
 0x351   : > { %3382 = vst [vmem:[#allocation78_spill] sm:$0xff] %v3012_v60 }
 0x353   : > { %v3014_v63 = vpop.f32.mrb[48].mxu1 }
 0x354   : > { %3383 = vst [vmem:[#allocation79_spill] sm:$0xff] %v3014_v63  ;;  %v3016_v28 = vpop.f32.mrb[49].mxu1 }
 0x355   : > { %3384 = vst [vmem:[#allocation80_spill] sm:$0xff] %v3016_v28 }
 0x357   : > { %v3018_v29 = vpop.f32.mrb[50].mxu1 }
 0x358   : > { %3385 = vst [vmem:[#allocation81_spill] sm:$0xff] %v3018_v29  ;;  %v3020_v27 = vpop.f32.mrb[51].mxu1 }
 0x359   : > { %3386 = vst [vmem:[#allocation82_spill] sm:$0xff] %v3020_v27 }
 0x35b   : > { %v3022_v57 = vpop.f32.mrb[52].mxu1 }
 0x35c   : > { %3387 = vst [vmem:[#allocation83_spill] sm:$0xff] %v3022_v57  ;;  %v3024_v24 = vpop.f32.mrb[53].mxu1 }
 0x35d   : > { %3388 = vst [vmem:[#allocation84_spill] sm:$0xff] %v3024_v24 }
 0x35f   : > { %v3026_v56 = vpop.f32.mrb[54].mxu1 }
 0x360   : > { %3389 = vst [vmem:[#allocation85_spill] sm:$0xff] %v3026_v56  ;;  %v3028_v32 = vpop.f32.mrb[55].mxu1  ;;  %v1016_v56 = vld [vmem:[#allocation8 + $0x18] sm:$0xff] (!%p1794_p1) }
 0x361   : > { %3390 = vst [vmem:[#allocation86_spill] sm:$0xff] %v3028_v32  ;;  %v1014_v32 = vld [vmem:[#allocation8 + $0x8] sm:$0xff] (!%p1794_p1) }
 0x363   : > { %v3030_v25 = vpop.f32.mrb[56].mxu1 }
 0x364   : > { %3391 = vst [vmem:[#allocation87_spill] sm:$0xff] %v3030_v25  ;;  %v3032_v31 = vpop.f32.mrb[57].mxu1  ;;  %v1013_v25 = vld [vmem:[#allocation8] sm:$0xff] (!%p1794_p1) }
 0x365   : > { %3392 = vst [vmem:[#allocation88_spill] sm:$0xff] %v3032_v31  ;;  %v1018_v31 = vld [vmem:[#allocation8 + $0x28] sm:$0xff] (!%p1794_p1) }
 0x367   : > { %v3034_v60 = vpop.f32.mrb[58].mxu1 }
 0x368   : > { %3393 = vst [vmem:[#allocation89_spill] sm:$0xff] %v3034_v60  ;;  %v3036_v63 = vpop.f32.mrb[59].mxu1  ;;  %v1930_v60 = vpack.c.bf16 (!%p1794_p1), %v1016_v56, %v1014_v32  ;;  %v1026_v32 = vld [vmem:[#allocation8 + $0x68] sm:$0xff] (!%p1794_p1)  ;;  %v1028_v56 = vld [vmem:[#allocation8 + $0x78] sm:$0xff] (!%p1794_p1) }
 0x369   : > { %3394 = vst [vmem:[#allocation90_spill] sm:$0xff] %v3036_v63  ;;  %v1015_v63 = vld [vmem:[#allocation8 + $0x10] sm:$0xff] (!%p1794_p1) }
 0x36a   : > { %v1932_v24 = vpack.c.bf16 (!%p1794_p1), %v1015_v63, %v1013_v25  ;;  %1931 = vmatprep.subr.bf16.mxu0 (!%p1794_p1), %v1930_v60  ;;  %1994 = vmatprep.subr.bf16.mxu1 (!%p1794_p1), %v1930_v60  ;;  %v1940_v25 = vpack.c.bf16 (!%p1794_p1), %v1023_v1, %v1021_v59  ;;  %v1025_v63 = vld [vmem:[#allocation8 + $0x60] sm:$0xff] (!%p1794_p1)  ;;  %v1030_v60 = vld [vmem:[#allocation8 + $0x88] sm:$0xff] (!%p1794_p1)  ;;  %v1035_v1 = vld [vmem:[#allocation8 + $0xb0] sm:$0xff] (!%p1794_p1) }
 0x36b   : > { %v3038_v28 = vpop.f32.mrb[60].mxu1  ;;  %1012 = sbr.rel (%p1794_p1) target bundleno = 1218 (0x4c2), region = 56 }
 0x36c   : > { %3395 = vst [vmem:[#allocation91_spill] sm:$0xff] %v3038_v28  ;;  %v3040_v29 = vpop.f32.mrb[61].mxu1  ;;  %v1020_v28 = vld [vmem:[#allocation8 + $0x38] sm:$0xff] (!%p1794_p1)  ;;  %1933 = vmatpush1.bf16.msra.mxu0 (!%p1794_p1), %v1932_v24  ;;  %2010 = vmatpush1.bf16.msra.mxu1 (!%p1794_p1), %v1932_v24 }
 0x36d   : > { %3396 = vst [vmem:[#allocation92_spill] sm:$0xff] %v3040_v29  ;;  %v1934_v29 = vpack.c.bf16 (!%p1794_p1), %v1020_v28, %v1018_v31  ;;  %v1942_v31 = vpack.c.bf16 (!%p1794_p1), %v1028_v56, %v1026_v32  ;;  %v1027_v28 = vld [vmem:[#allocation8 + $0x70] sm:$0xff] (!%p1794_p1)  ;;  %v1038_v32 = vld [vmem:[#allocation8 + $0xc8] sm:$0xff] (!%p1794_p1)  ;;  %v1040_v56 = vld [vmem:[#allocation8 + $0xd8] sm:$0xff] (!%p1794_p1) }
 0x36e   : > { %v1944_v24 = vpack.c.bf16 (!%p1794_p1), %v1027_v28, %v1025_v63  ;;  %v1039_v63 = vld [vmem:[#allocation8 + $0xd0] sm:$0xff] (!%p1794_p1)  ;;  %v1042_v28 = vld [vmem:[#allocation8 + $0xe8] sm:$0xff] (!%p1794_p1) }
 0x36f   : > { %v3042_v27 = vpop.f32.mrb[62].mxu1  ;;  %1935 = vmatprep.subr.bf16.mxu0 (!%p1794_p1), %v1934_v29  ;;  %1995 = vmatprep.subr.bf16.mxu1 (!%p1794_p1), %v1934_v29  ;;  %v1034_v29 = vld [vmem:[#allocation8 + $0xa8] sm:$0xff] (!%p1794_p1) }
 0x370   : > { %3397 = vst [vmem:[#allocation93_spill] sm:$0xff] %v3042_v27  ;;  %v3044_v57 = vpop.f32.mrb[63].mxu1  ;;  %v1019_v27 = vld [vmem:[#allocation8 + $0x30] sm:$0xff] (!%p1794_p1) }
 0x371   : > { %3398 = vst [vmem:[#allocation94_spill] sm:$0xff] %v3044_v57  ;;  %v1024_v57 = vld [vmem:[#allocation8 + $0x58] sm:$0xff] (!%p1794_p1)  ;;  %v1936_v0 = vpack.c.bf16 (!%p1794_p1), %v1019_v27, %v1017_v61  ;;  %v1031_v61 = vld [vmem:[#allocation8 + $0x90] sm:$0xff] (!%p1794_p1) }
 0x372   : > { %v1938_v41 = vpack.c.bf16 %v1024_v57, %v1022_v30  ;;  %v1946_v30 = vpack.c.bf16 %v1032_v23, %v1030_v60  ;;  %v1029_v57 = vld [vmem:[#allocation8 + $0x80] sm:$0xff]  ;;  %v1036_v27 = vld [vmem:[#allocation8 + $0xb8] sm:$0xff]  ;;  %v1954_v23 = vpack.c.bf16 %v1040_v56, %v1038_v32  ;;  %v1050_v32 = vld [vmem:[#allocation8 + $0x128] sm:$0xff] }
 0x373   : > { %1937 = vmatpush1.bf16.msra.mxu0 %v1936_v0  ;;  %2011 = vmatpush1.bf16.msra.mxu1 %v1936_v0  ;;  %v1948_v59 = vpack.c.bf16 %v1031_v61, %v1029_v57  ;;  %v1950_v0 = vpack.c.bf16 %v1036_v27, %v1034_v29  ;;  %v1044_v60 = vld [vmem:[#allocation8 + $0xf8] sm:$0xff]  ;;  %v1041_v57 = vld [vmem:[#allocation8 + $0xe0] sm:$0xff]  ;;  %v1043_v61 = vld [vmem:[#allocation8 + $0xf0] sm:$0xff] }
 0x374   : > { %1939 = vmatprep.subr.bf16.mxu0 %v1938_v41  ;;  %1996 = vmatprep.subr.bf16.mxu1 %v1938_v41  ;;  %v1033_v41 = vld [vmem:[#allocation8 + $0xa0] sm:$0xff]  ;;  %v1046_v29 = vld [vmem:[#allocation8 + $0x108] sm:$0xff]  ;;  %v1048_v27 = vld [vmem:[#allocation8 + $0x118] sm:$0xff] }
 0x375   : > { %v1052_v56 = vld [vmem:[#allocation8 + $0x138] sm:$0xff] }
 0x377   : > { %1941 = vmatpush1.bf16.msra.mxu0 %v1940_v25  ;;  %2012 = vmatpush1.bf16.msra.mxu1 %v1940_v25  ;;  %v1952_v25 = vpack.c.bf16 %v1035_v1, %v1033_v41  ;;  %v1045_v41 = vld [vmem:[#allocation8 + $0x100] sm:$0xff]  ;;  %v1047_v1 = vld [vmem:[#allocation8 + $0x110] sm:$0xff] }
 0x378   : > { %1943 = vmatprep.subr.bf16.mxu0 %v1942_v31  ;;  %1997 = vmatprep.subr.bf16.mxu1 %v1942_v31  ;;  %v1037_v31 = vld [vmem:[#allocation8 + $0xc0] sm:$0xff] }
 0x37b   : > { %1945 = vmatpush1.bf16.msra.mxu0 %v1944_v24  ;;  %2013 = vmatpush1.bf16.msra.mxu1 %v1944_v24  ;;  %v1956_v24 = vpack.c.bf16 %v1039_v63, %v1037_v31  ;;  %v1049_v31 = vld [vmem:[#allocation8 + $0x120] sm:$0xff]  ;;  %v1051_v63 = vld [vmem:[#allocation8 + $0x130] sm:$0xff] }
 0x37c   : > { %1947 = vmatprep.subr.bf16.mxu0 %v1946_v30  ;;  %1998 = vmatprep.subr.bf16.mxu1 %v1946_v30  ;;  %v1958_v30 = vpack.c.bf16 %v1044_v60, %v1042_v28  ;;  %v1054_v28 = vld [vmem:[#allocation8 + $0x148] sm:$0xff]  ;;  %v1056_v60 = vld [vmem:[#allocation8 + $0x158] sm:$0xff] }
 0x37f   : > { %1949 = vmatpush1.bf16.msra.mxu0 %v1948_v59  ;;  %2014 = vmatpush1.bf16.msra.mxu1 %v1948_v59  ;;  %v1960_v59 = vpack.c.bf16 %v1043_v61, %v1041_v57  ;;  %v1053_v57 = vld [vmem:[#allocation8 + $0x140] sm:$0xff]  ;;  %v1055_v61 = vld [vmem:[#allocation8 + $0x150] sm:$0xff] }
 0x380   : > { %1951 = vmatprep.subr.bf16.mxu0 %v1950_v0  ;;  %1999 = vmatprep.subr.bf16.mxu1 %v1950_v0  ;;  %v1962_v0 = vpack.c.bf16 %v1048_v27, %v1046_v29  ;;  %v1058_v29 = vld [vmem:[#allocation8 + $0x168] sm:$0xff]  ;;  %v1060_v27 = vld [vmem:[#allocation8 + $0x178] sm:$0xff] }
 0x383   : > { %1953 = vmatpush1.bf16.msra.mxu0 %v1952_v25  ;;  %2015 = vmatpush1.bf16.msra.mxu1 %v1952_v25  ;;  %v1964_v25 = vpack.c.bf16 %v1047_v1, %v1045_v41  ;;  %v1057_v41 = vld [vmem:[#allocation8 + $0x160] sm:$0xff]  ;;  %v1059_v1 = vld [vmem:[#allocation8 + $0x170] sm:$0xff] }
 0x384   : > { %1955 = vmatprep.subr.bf16.mxu0 %v1954_v23  ;;  %2000 = vmatprep.subr.bf16.mxu1 %v1954_v23  ;;  %v1966_v23 = vpack.c.bf16 %v1052_v56, %v1050_v32  ;;  %v1062_v32 = vld [vmem:[#allocation8 + $0x188] sm:$0xff]  ;;  %v1064_v56 = vld [vmem:[#allocation8 + $0x198] sm:$0xff] }
 0x387   : > { %1957 = vmatpush1.bf16.msra.mxu0 %v1956_v24  ;;  %2016 = vmatpush1.bf16.msra.mxu1 %v1956_v24  ;;  %v1968_v24 = vpack.c.bf16 %v1051_v63, %v1049_v31  ;;  %v1061_v31 = vld [vmem:[#allocation8 + $0x180] sm:$0xff]  ;;  %v1063_v63 = vld [vmem:[#allocation8 + $0x190] sm:$0xff] }
 0x388   : > { %1959 = vmatprep.subr.bf16.mxu0 %v1958_v30  ;;  %2001 = vmatprep.subr.bf16.mxu1 %v1958_v30  ;;  %v1970_v30 = vpack.c.bf16 %v1056_v60, %v1054_v28  ;;  %v1066_v28 = vld [vmem:[#allocation8 + $0x1a8] sm:$0xff]  ;;  %v1068_v60 = vld [vmem:[#allocation8 + $0x1b8] sm:$0xff] }
 0x38b   : > { %1961 = vmatpush1.bf16.msra.mxu0 %v1960_v59  ;;  %2017 = vmatpush1.bf16.msra.mxu1 %v1960_v59  ;;  %v1972_v59 = vpack.c.bf16 %v1055_v61, %v1053_v57  ;;  %v1065_v57 = vld [vmem:[#allocation8 + $0x1a0] sm:$0xff]  ;;  %v1067_v61 = vld [vmem:[#allocation8 + $0x1b0] sm:$0xff] }
 0x38c   : > { %1963 = vmatprep.subr.bf16.mxu0 %v1962_v0  ;;  %2002 = vmatprep.subr.bf16.mxu1 %v1962_v0  ;;  %v1974_v0 = vpack.c.bf16 %v1060_v27, %v1058_v29  ;;  %v1070_v29 = vld [vmem:[#allocation8 + $0x1c8] sm:$0xff]  ;;  %v1072_v27 = vld [vmem:[#allocation8 + $0x1d8] sm:$0xff] }
 0x38f   : > { %1965 = vmatpush1.bf16.msra.mxu0 %v1964_v25  ;;  %2018 = vmatpush1.bf16.msra.mxu1 %v1964_v25  ;;  %v1976_v25 = vpack.c.bf16 %v1059_v1, %v1057_v41  ;;  %v1069_v41 = vld [vmem:[#allocation8 + $0x1c0] sm:$0xff]  ;;  %v1071_v1 = vld [vmem:[#allocation8 + $0x1d0] sm:$0xff] }
 0x390   : > { %1967 = vmatprep.subr.bf16.mxu0 %v1966_v23  ;;  %2003 = vmatprep.subr.bf16.mxu1 %v1966_v23  ;;  %v1978_v23 = vpack.c.bf16 %v1064_v56, %v1062_v32  ;;  %v1074_v32 = vld [vmem:[#allocation8 + $0x1e8] sm:$0xff]  ;;  %v1076_v56 = vld [vmem:[#allocation8 + $0x1f8] sm:$0xff] }
 0x393   : > { %1969 = vmatpush1.bf16.msra.mxu0 %v1968_v24  ;;  %2019 = vmatpush1.bf16.msra.mxu1 %v1968_v24  ;;  %v1980_v24 = vpack.c.bf16 %v1063_v63, %v1061_v31  ;;  %v1073_v31 = vld [vmem:[#allocation8 + $0x1e0] sm:$0xff]  ;;  %v1075_v63 = vld [vmem:[#allocation8 + $0x1f0] sm:$0xff] }
 0x394   : > { %1971 = vmatprep.subr.bf16.mxu0 %v1970_v30  ;;  %2004 = vmatprep.subr.bf16.mxu1 %v1970_v30  ;;  %v1982_v30 = vpack.c.bf16 %v1068_v60, %v1066_v28  ;;  %v1992_v28 = vpack.c.bf16 %v1075_v63, %v1073_v31 }
 0x397   : > { %1973 = vmatpush1.bf16.msra.mxu0 %v1972_v59  ;;  %2020 = vmatpush1.bf16.msra.mxu1 %v1972_v59  ;;  %v1984_v59 = vpack.c.bf16 %v1067_v61, %v1065_v57 }
 0x398   : > { %1975 = vmatprep.subr.bf16.mxu0 %v1974_v0  ;;  %2005 = vmatprep.subr.bf16.mxu1 %v1974_v0  ;;  %v1986_v0 = vpack.c.bf16 %v1072_v27, %v1070_v29  ;;  %v3425_v29 = vld [vmem:[#allocation37_spill] sm:$0xff] }
 0x39b   : > { %1977 = vmatpush1.bf16.msra.mxu0 %v1976_v25  ;;  %2021 = vmatpush1.bf16.msra.mxu1 %v1976_v25  ;;  %v1988_v25 = vpack.c.bf16 %v1071_v1, %v1069_v41 }
 0x39c   : > { %1979 = vmatprep.subr.bf16.mxu0 %v1978_v23  ;;  %2006 = vmatprep.subr.bf16.mxu1 %v1978_v23  ;;  %v1990_v23 = vpack.c.bf16 %v1076_v56, %v1074_v32  ;;  %v3427_v32 = vld [vmem:[#allocation38_spill] sm:$0xff] }
 0x39f   : > { %1981 = vmatpush1.bf16.msra.mxu0 %v1980_v24  ;;  %2022 = vmatpush1.bf16.msra.mxu1 %v1980_v24  ;;  %v3424_v24 = vld [vmem:[#allocation67_spill] sm:$0xff] }
 0x3a0   : > { %1983 = vmatprep.subr.bf16.mxu0 %v1982_v30  ;;  %2007 = vmatprep.subr.bf16.mxu1 %v1982_v30 }
 0x3a3   : > { %1985 = vmatpush1.bf16.msra.mxu0 %v1984_v59  ;;  %2023 = vmatpush1.bf16.msra.mxu1 %v1984_v59  ;;  %v3426_v59 = vld [vmem:[#allocation68_spill] sm:$0xff] }
 0x3a4   : > { %1987 = vmatprep.subr.bf16.mxu0 %v1986_v0  ;;  %2008 = vmatprep.subr.bf16.mxu1 %v1986_v0 }
 0x3a7   : > { %1989 = vmatpush1.bf16.msra.mxu0 %v1988_v25  ;;  %2024 = vmatpush1.bf16.msra.mxu1 %v1988_v25  ;;  %v3428_v25 = vld [vmem:[#allocation69_spill] sm:$0xff] }
 0x3a8   : > { %1991 = vmatprep.subr.bf16.mxu0 %v1990_v23  ;;  %2009 = vmatprep.subr.bf16.mxu1 %v1990_v23 }
 0x3ab   : > { %1993 = vmatpush1.bf16.msra.mxu0 %v1992_v28  ;;  %2025 = vmatpush1.bf16.msra.mxu1 %v1992_v28  ;;  %v3429_v28 = vld [vmem:[#allocation39_spill] sm:$0xff] }
 0x3ae   : > { %1142 = vmatmul.mubr.f32.vlgmr.msra.gmra.mrb[0].mxu0 %v2665_v33  ;;  %1238 = vmatmul.mubr.f32.vlgmr.msra.gmra.mrb[0].mxu1 %v2761_v2  ;;  %v3399_v33 = vld [vmem:[#allocation24_spill] sm:$0xff] }
 0x3af   : > { %1147 = vmatprep.mubr.f32.mxu0 %v2667_v34  ;;  %1243 = vmatprep.mubr.f32.mxu1 %v2763_v3  ;;  %v3400_v34 = vld [vmem:[#allocation15_spill] sm:$0xff] }
 0x3b2   : > { %1148 = vmatmul.mubr.f32.gmra.mrb[2].mxu0 %v2671_v35  ;;  %1244 = vmatmul.mubr.f32.gmra.mrb[2].mxu1 %v2767_v4  ;;  %v3401_v35 = vld [vmem:[#allocation25_spill] sm:$0xff] }
 0x3b3   : > { %1153 = vmatprep.mubr.f32.mxu0 %v2673_v36  ;;  %1249 = vmatprep.mubr.f32.mxu1 %v2769_v5  ;;  %v3402_v36 = vld [vmem:[#allocation16_spill] sm:$0xff] }
 0x3b6   : > { %1154 = vmatmul.mubr.f32.gmra.mrb[4].mxu0 %v2677_v37  ;;  %1250 = vmatmul.mubr.f32.gmra.mrb[4].mxu1 %v2773_v6  ;;  %v3403_v37 = vld [vmem:[#allocation26_spill] sm:$0xff]  ;;  %v3418_v6 = vld [vmem:[#allocation64_spill] sm:$0xff] }
 0x3b7   : > { %1159 = vmatprep.mubr.f32.mxu0 %v2679_v38  ;;  %1255 = vmatprep.mubr.f32.mxu1 %v2775_v7  ;;  %v3404_v38 = vld [vmem:[#allocation17_spill] sm:$0xff] }
 0x3ba   : > { %1160 = vmatmul.mubr.f32.gmra.mrb[6].mxu0 %v2683_v39  ;;  %1256 = vmatmul.mubr.f32.gmra.mrb[6].mxu1 %v2779_v8  ;;  %v3405_v39 = vld [vmem:[#allocation27_spill] sm:$0xff] }
 0x3bb   : > { %1165 = vmatprep.mubr.f32.mxu0 %v2685_v40  ;;  %1261 = vmatprep.mubr.f32.mxu1 %v2781_v9  ;;  %v3406_v40 = vld [vmem:[#allocation18_spill] sm:$0xff] }
 0x3be   : > { %1166 = vmatmul.mubr.f32.gmra.mrb[8].mxu0 %v2689_v42  ;;  %1262 = vmatmul.mubr.f32.gmra.mrb[8].mxu1 %v2785_v10  ;;  %v3407_v42 = vld [vmem:[#allocation28_spill] sm:$0xff]  ;;  %v3419_v10 = vld [vmem:[#allocation34_spill] sm:$0xff] }
 0x3bf   : > { %1171 = vmatprep.mubr.f32.mxu0 %v2691_v43  ;;  %1267 = vmatprep.mubr.f32.mxu1 %v2787_v11  ;;  %v3408_v43 = vld [vmem:[#allocation19_spill] sm:$0xff] }
 0x3c2   : > { %1172 = vmatmul.mubr.f32.gmra.mrb[10].mxu0 %v2695_v44  ;;  %1268 = vmatmul.mubr.f32.gmra.mrb[10].mxu1 %v2791_v12  ;;  %v3409_v44 = vld [vmem:[#allocation29_spill] sm:$0xff] }
 0x3c3   : > { %1177 = vmatprep.mubr.f32.mxu0 %v2697_v45  ;;  %1273 = vmatprep.mubr.f32.mxu1 %v2793_v13  ;;  %v3410_v45 = vld [vmem:[#allocation20_spill] sm:$0xff]  ;;  %v3420_v12 = vld [vmem:[#allocation65_spill] sm:$0xff] }
 0x3c6   : > { %1178 = vmatmul.mubr.f32.gmra.mrb[12].mxu0 %v2701_v46  ;;  %1274 = vmatmul.mubr.f32.gmra.mrb[12].mxu1 %v2797_v14  ;;  %v3411_v46 = vld [vmem:[#allocation30_spill] sm:$0xff] }
 0x3c7   : > { %1183 = vmatprep.mubr.f32.mxu0 %v2703_v47  ;;  %1279 = vmatprep.mubr.f32.mxu1 %v2799_v15  ;;  %v3412_v47 = vld [vmem:[#allocation21_spill] sm:$0xff] }
 0x3ca   : > { %1184 = vmatmul.mubr.f32.gmra.mrb[14].mxu0 %v2707_v48  ;;  %1280 = vmatmul.mubr.f32.gmra.mrb[14].mxu1 %v2803_v16  ;;  %v3413_v48 = vld [vmem:[#allocation31_spill] sm:$0xff] }
 0x3cb   : > { %1189 = vmatprep.mubr.f32.mxu0 %v2709_v49  ;;  %1285 = vmatprep.mubr.f32.mxu1 %v2805_v17  ;;  %v3414_v49 = vld [vmem:[#allocation22_spill] sm:$0xff]  ;;  %v3421_v16 = vld [vmem:[#allocation35_spill] sm:$0xff] }
 0x3ce   : > { %1190 = vmatmul.mubr.f32.gmra.mrb[16].mxu0 %v2713_v50  ;;  %1286 = vmatmul.mubr.f32.gmra.mrb[16].mxu1 %v2809_v18  ;;  %v3415_v50 = vld [vmem:[#allocation32_spill] sm:$0xff]  ;;  %v3422_v18 = vld [vmem:[#allocation66_spill] sm:$0xff] }
 0x3cf   : > { %1195 = vmatprep.mubr.f32.mxu0 %v2715_v51  ;;  %1291 = vmatprep.mubr.f32.mxu1 %v2811_v19  ;;  %v3416_v51 = vld [vmem:[#allocation23_spill] sm:$0xff] }
 0x3d2   : > { %1196 = vmatmul.mubr.f32.gmra.mrb[18].mxu0 %v2719_v52  ;;  %1292 = vmatmul.mubr.f32.gmra.mrb[18].mxu1 %v2815_v20  ;;  %v3417_v52 = vld [vmem:[#allocation33_spill] sm:$0xff] }
 0x3d3   : > { %1201 = vmatprep.mubr.f32.mxu0 %v2721_v53  ;;  %1297 = vmatprep.mubr.f32.mxu1 %v2817_v21 }
 0x3d6   : > { %1202 = vmatmul.mubr.f32.gmra.mrb[20].mxu0 %v2725_v54  ;;  %1298 = vmatmul.mubr.f32.gmra.mrb[20].mxu1 %v2821_v22  ;;  %v3423_v22 = vld [vmem:[#allocation36_spill] sm:$0xff] }
 0x3d7   : > { %1207 = vmatprep.mubr.f32.mxu0 %v2727_v55  ;;  %1303 = vmatprep.mubr.f32.mxu1 %v3399_v33 }
 0x3da   : > { %1208 = vmatmul.mubr.f32.gmra.mrb[22].mxu0 %v3400_v34  ;;  %1304 = vmatmul.mubr.f32.gmra.mrb[22].mxu1 %v3401_v35  ;;  %v3430_v34 = vld [vmem:[#allocation70_spill] sm:$0xff] }
 0x3db   : > { %1213 = vmatprep.mubr.f32.mxu0 %v3402_v36  ;;  %1309 = vmatprep.mubr.f32.mxu1 %v3403_v37 }
 0x3de   : > { %1214 = vmatmul.mubr.f32.gmra.mrb[24].mxu0 %v3404_v38  ;;  %1310 = vmatmul.mubr.f32.gmra.mrb[24].mxu1 %v3405_v39  ;;  %v3431_v38 = vld [vmem:[#allocation40_spill] sm:$0xff] }
 0x3df   : > { %1219 = vmatprep.mubr.f32.mxu0 %v3406_v40  ;;  %1315 = vmatprep.mubr.f32.mxu1 %v3407_v42  ;;  %v3432_v40 = vld [vmem:[#allocation71_spill] sm:$0xff] }
 0x3e2   : > { %1220 = vmatmul.mubr.f32.gmra.mrb[26].mxu0 %v3408_v43  ;;  %1316 = vmatmul.mubr.f32.gmra.mrb[26].mxu1 %v3409_v44 }
 0x3e3   : > { %1225 = vmatprep.mubr.f32.mxu0 %v3410_v45  ;;  %1321 = vmatprep.mubr.f32.mxu1 %v3411_v46  ;;  %v3433_v45 = vld [vmem:[#allocation41_spill] sm:$0xff] }
 0x3e6   : > { %1226 = vmatmul.mubr.f32.gmra.mrb[28].mxu0 %v3412_v47  ;;  %1322 = vmatmul.mubr.f32.gmra.mrb[28].mxu1 %v3413_v48  ;;  %v3434_v47 = vld [vmem:[#allocation72_spill] sm:$0xff] }
 0x3e7   : > { %1231 = vmatprep.mubr.f32.mxu0 %v3414_v49  ;;  %1327 = vmatprep.mubr.f32.mxu1 %v3415_v50 }
 0x3ea   : > { %1232 = vmatmul.mubr.f32.gmra.mrb[30].mxu0 %v3416_v51  ;;  %1328 = vmatmul.mubr.f32.gmra.mrb[30].mxu1 %v3417_v52  ;;  %v3435_v51 = vld [vmem:[#allocation42_spill] sm:$0xff] }
 0x481   : > { %v1143_v53 = vpop.f32.mrb[0].mxu0  ;;  %v1239_v54 = vpop.f32.mrb[0].mxu1 }
 0x482   : > { %v1334_v55 = vadd.f32 %v1143_v53, %v2918_v26  ;;  %v1366_v2 = vadd.f32 %v1239_v54, %v2982_v62  ;;  %v1145_v3 = vpop.f32.mrb[1].mxu0  ;;  %v1241_v4 = vpop.f32.mrb[1].mxu1  ;;  %v3436_v53 = vld [vmem:[#allocation73_spill] sm:$0xff] }
 0x483   : > { %v1335_v5 = vadd.f32 %v1145_v3, %v2920_v58  ;;  %v1367_v7 = vadd.f32 %v1241_v4, %v3418_v6  ;;  %v3437_v3 = vld [vmem:[#allocation43_spill] sm:$0xff] }
 0x484   : > { %1398 = vst [vmem:[#allocation10] sm:$0xff] %v1334_v55  ;;  %1430 = vst [vmem:[#allocation10 + $0x100] sm:$0xff] %v1366_v2 }
 0x485   : > { %1399 = vst [vmem:[#allocation10 + $0x8] sm:$0xff] %v1335_v5  ;;  %1431 = vst [vmem:[#allocation10 + $0x108] sm:$0xff] %v1367_v7  ;;  %v1149_v8 = vpop.f32.mrb[2].mxu0  ;;  %v1245_v9 = vpop.f32.mrb[2].mxu1  ;;  %v3438_v5 = vld [vmem:[#allocation74_spill] sm:$0xff] }
 0x486   : > { %v1336_v11 = vadd.f32 %v1149_v8, %v3419_v10  ;;  %v1368_v13 = vadd.f32 %v1245_v9, %v3420_v12  ;;  %v1151_v14 = vpop.f32.mrb[3].mxu0  ;;  %v1247_v15 = vpop.f32.mrb[3].mxu1  ;;  %v3439_v9 = vld [vmem:[#allocation44_spill] sm:$0xff] }
 0x487   : > { %v1337_v17 = vadd.f32 %v1151_v14, %v3421_v16  ;;  %v1369_v19 = vadd.f32 %v1247_v15, %v3422_v18  ;;  %v3441_v15 = vld [vmem:[#allocation45_spill] sm:$0xff] }
 0x488   : > { %1400 = vst [vmem:[#allocation10 + $0x10] sm:$0xff] %v1336_v11  ;;  %1432 = vst [vmem:[#allocation10 + $0x110] sm:$0xff] %v1368_v13  ;;  %v3440_v11 = vld [vmem:[#allocation75_spill] sm:$0xff] }
 0x489   : > { %1401 = vst [vmem:[#allocation10 + $0x18] sm:$0xff] %v1337_v17  ;;  %1433 = vst [vmem:[#allocation10 + $0x118] sm:$0xff] %v1369_v19  ;;  %v1155_v20 = vpop.f32.mrb[4].mxu0  ;;  %v1251_v21 = vpop.f32.mrb[4].mxu1  ;;  %v3442_v17 = vld [vmem:[#allocation76_spill] sm:$0xff] }
 0x48a   : > { %v1338_v60 = vadd.f32 %v1155_v20, %v3423_v22  ;;  %v1370_v30 = vadd.f32 %v1251_v21, %v3424_v24  ;;  %v1157_v57 = vpop.f32.mrb[5].mxu0  ;;  %v1253_v61 = vpop.f32.mrb[5].mxu1  ;;  %v3443_v21 = vld [vmem:[#allocation46_spill] sm:$0xff] }
 0x48b   : > { %v1339_v27 = vadd.f32 %v1157_v57, %v3425_v29  ;;  %v1371_v0 = vadd.f32 %v1253_v61, %v3426_v59  ;;  %v3445_v61 = vld [vmem:[#allocation47_spill] sm:$0xff] }
 0x48c   : > { %1402 = vst [vmem:[#allocation10 + $0x20] sm:$0xff] %v1338_v60  ;;  %1434 = vst [vmem:[#allocation10 + $0x120] sm:$0xff] %v1370_v30  ;;  %v3444_v60 = vld [vmem:[#allocation77_spill] sm:$0xff] }
 0x48d   : > { %1403 = vst [vmem:[#allocation10 + $0x28] sm:$0xff] %v1339_v27  ;;  %1435 = vst [vmem:[#allocation10 + $0x128] sm:$0xff] %v1371_v0  ;;  %v1161_v41 = vpop.f32.mrb[6].mxu0  ;;  %v1257_v1 = vpop.f32.mrb[6].mxu1  ;;  %v3446_v27 = vld [vmem:[#allocation78_spill] sm:$0xff] }
 0x48e   : > { %v1340_v56 = vadd.f32 %v1161_v41, %v3427_v32  ;;  %v1372_v23 = vadd.f32 %v1257_v1, %v3428_v25  ;;  %v1163_v31 = vpop.f32.mrb[7].mxu0  ;;  %v1259_v63 = vpop.f32.mrb[7].mxu1  ;;  %v3447_v1 = vld [vmem:[#allocation48_spill] sm:$0xff] }
 0x48f   : > { %v1341_v33 = vadd.f32 %v1163_v31, %v3429_v28  ;;  %v1373_v35 = vadd.f32 %v1259_v63, %v3430_v34  ;;  %v3449_v63 = vld [vmem:[#allocation49_spill] sm:$0xff] }
 0x490   : > { %1404 = vst [vmem:[#allocation10 + $0x30] sm:$0xff] %v1340_v56  ;;  %1436 = vst [vmem:[#allocation10 + $0x130] sm:$0xff] %v1372_v23  ;;  %v3448_v56 = vld [vmem:[#allocation79_spill] sm:$0xff] }
 0x491   : > { %1405 = vst [vmem:[#allocation10 + $0x38] sm:$0xff] %v1341_v33  ;;  %1437 = vst [vmem:[#allocation10 + $0x138] sm:$0xff] %v1373_v35  ;;  %v1167_v36 = vpop.f32.mrb[8].mxu0  ;;  %v1263_v37 = vpop.f32.mrb[8].mxu1  ;;  %v3450_v33 = vld [vmem:[#allocation80_spill] sm:$0xff] }
 0x492   : > { %v1342_v39 = vadd.f32 %v1167_v36, %v3431_v38  ;;  %v1374_v42 = vadd.f32 %v1263_v37, %v3432_v40  ;;  %v1169_v43 = vpop.f32.mrb[9].mxu0  ;;  %v1265_v44 = vpop.f32.mrb[9].mxu1  ;;  %v3451_v37 = vld [vmem:[#allocation50_spill] sm:$0xff] }
 0x493   : > { %v1343_v46 = vadd.f32 %v1169_v43, %v3433_v45  ;;  %v1375_v48 = vadd.f32 %v1265_v44, %v3434_v47  ;;  %v3453_v44 = vld [vmem:[#allocation51_spill] sm:$0xff] }
 0x494   : > { %1406 = vst [vmem:[#allocation10 + $0x40] sm:$0xff] %v1342_v39  ;;  %1438 = vst [vmem:[#allocation10 + $0x140] sm:$0xff] %v1374_v42  ;;  %v3452_v39 = vld [vmem:[#allocation81_spill] sm:$0xff] }
 0x495   : > { %1407 = vst [vmem:[#allocation10 + $0x48] sm:$0xff] %v1343_v46  ;;  %1439 = vst [vmem:[#allocation10 + $0x148] sm:$0xff] %v1375_v48  ;;  %v1173_v49 = vpop.f32.mrb[10].mxu0  ;;  %v1269_v50 = vpop.f32.mrb[10].mxu1  ;;  %v3454_v46 = vld [vmem:[#allocation82_spill] sm:$0xff] }
 0x496   : > { %v1344_v52 = vadd.f32 %v1173_v49, %v3435_v51  ;;  %v1376_v54 = vadd.f32 %v1269_v50, %v3436_v53  ;;  %v1175_v55 = vpop.f32.mrb[11].mxu0  ;;  %v1271_v2 = vpop.f32.mrb[11].mxu1  ;;  %v3455_v50 = vld [vmem:[#allocation52_spill] sm:$0xff] }
 0x497   : > { %v1345_v4 = vadd.f32 %v1175_v55, %v3437_v3  ;;  %v1377_v6 = vadd.f32 %v1271_v2, %v3438_v5  ;;  %v3457_v2 = vld [vmem:[#allocation53_spill] sm:$0xff] }
 0x498   : > { %1408 = vst [vmem:[#allocation10 + $0x50] sm:$0xff] %v1344_v52  ;;  %1440 = vst [vmem:[#allocation10 + $0x150] sm:$0xff] %v1376_v54  ;;  %v3456_v52 = vld [vmem:[#allocation83_spill] sm:$0xff] }
 0x499   : > { %1409 = vst [vmem:[#allocation10 + $0x58] sm:$0xff] %v1345_v4  ;;  %1441 = vst [vmem:[#allocation10 + $0x158] sm:$0xff] %v1377_v6  ;;  %v1179_v7 = vpop.f32.mrb[12].mxu0  ;;  %v1275_v8 = vpop.f32.mrb[12].mxu1  ;;  %v3458_v4 = vld [vmem:[#allocation84_spill] sm:$0xff] }
 0x49a   : > { %v1346_v10 = vadd.f32 %v1179_v7, %v3439_v9  ;;  %v1378_v12 = vadd.f32 %v1275_v8, %v3440_v11  ;;  %v1181_v13 = vpop.f32.mrb[13].mxu0  ;;  %v1277_v14 = vpop.f32.mrb[13].mxu1  ;;  %v3459_v8 = vld [vmem:[#allocation54_spill] sm:$0xff] }
 0x49b   : > { %v1347_v16 = vadd.f32 %v1181_v13, %v3441_v15  ;;  %v1379_v18 = vadd.f32 %v1277_v14, %v3442_v17  ;;  %v3461_v14 = vld [vmem:[#allocation55_spill] sm:$0xff] }
 0x49c   : > { %1410 = vst [vmem:[#allocation10 + $0x60] sm:$0xff] %v1346_v10  ;;  %1442 = vst [vmem:[#allocation10 + $0x160] sm:$0xff] %v1378_v12  ;;  %v3460_v10 = vld [vmem:[#allocation85_spill] sm:$0xff] }
 0x49d   : > { %1411 = vst [vmem:[#allocation10 + $0x68] sm:$0xff] %v1347_v16  ;;  %1443 = vst [vmem:[#allocation10 + $0x168] sm:$0xff] %v1379_v18  ;;  %v1185_v19 = vpop.f32.mrb[14].mxu0  ;;  %v1281_v20 = vpop.f32.mrb[14].mxu1  ;;  %v3462_v16 = vld [vmem:[#allocation86_spill] sm:$0xff] }
 0x49e   : > { %v1348_v22 = vadd.f32 %v1185_v19, %v3443_v21  ;;  %v1380_v24 = vadd.f32 %v1281_v20, %v3444_v60  ;;  %v1187_v30 = vpop.f32.mrb[15].mxu0  ;;  %v1283_v57 = vpop.f32.mrb[15].mxu1  ;;  %v3463_v20 = vld [vmem:[#allocation56_spill] sm:$0xff] }
 0x49f   : > { %v1349_v29 = vadd.f32 %v1187_v30, %v3445_v61  ;;  %v1381_v59 = vadd.f32 %v1283_v57, %v3446_v27  ;;  %v3465_v57 = vld [vmem:[#allocation57_spill] sm:$0xff] }
 0x4a0   : > { %1412 = vst [vmem:[#allocation10 + $0x70] sm:$0xff] %v1348_v22  ;;  %1444 = vst [vmem:[#allocation10 + $0x170] sm:$0xff] %v1380_v24  ;;  %v3464_v22 = vld [vmem:[#allocation87_spill] sm:$0xff] }
 0x4a1   : > { %1413 = vst [vmem:[#allocation10 + $0x78] sm:$0xff] %v1349_v29  ;;  %1445 = vst [vmem:[#allocation10 + $0x178] sm:$0xff] %v1381_v59  ;;  %v1191_v0 = vpop.f32.mrb[16].mxu0  ;;  %v1287_v41 = vpop.f32.mrb[16].mxu1  ;;  %v3466_v29 = vld [vmem:[#allocation88_spill] sm:$0xff] }
 0x4a2   : > { %v1350_v32 = vadd.f32 %v1191_v0, %v3447_v1  ;;  %v1382_v25 = vadd.f32 %v1287_v41, %v3448_v56  ;;  %v1193_v23 = vpop.f32.mrb[17].mxu0  ;;  %v1289_v31 = vpop.f32.mrb[17].mxu1  ;;  %v3467_v41 = vld [vmem:[#allocation58_spill] sm:$0xff] }
 0x4a3   : > { %v1351_v28 = vadd.f32 %v1193_v23, %v3449_v63  ;;  %v1383_v34 = vadd.f32 %v1289_v31, %v3450_v33  ;;  %v3469_v31 = vld [vmem:[#allocation59_spill] sm:$0xff] }
 0x4a4   : > { %1414 = vst [vmem:[#allocation10 + $0x80] sm:$0xff] %v1350_v32  ;;  %1446 = vst [vmem:[#allocation10 + $0x180] sm:$0xff] %v1382_v25  ;;  %v3468_v32 = vld [vmem:[#allocation89_spill] sm:$0xff] }
 0x4a5   : > { %1415 = vst [vmem:[#allocation10 + $0x88] sm:$0xff] %v1351_v28  ;;  %1447 = vst [vmem:[#allocation10 + $0x188] sm:$0xff] %v1383_v34  ;;  %v1197_v35 = vpop.f32.mrb[18].mxu0  ;;  %v1293_v36 = vpop.f32.mrb[18].mxu1  ;;  %v3470_v28 = vld [vmem:[#allocation90_spill] sm:$0xff] }
 0x4a6   : > { %v1352_v38 = vadd.f32 %v1197_v35, %v3451_v37  ;;  %v1384_v40 = vadd.f32 %v1293_v36, %v3452_v39  ;;  %v1199_v42 = vpop.f32.mrb[19].mxu0  ;;  %v1295_v43 = vpop.f32.mrb[19].mxu1  ;;  %v3471_v36 = vld [vmem:[#allocation60_spill] sm:$0xff] }
 0x4a7   : > { %v1353_v45 = vadd.f32 %v1199_v42, %v3453_v44  ;;  %v1385_v47 = vadd.f32 %v1295_v43, %v3454_v46  ;;  %v3473_v43 = vld [vmem:[#allocation61_spill] sm:$0xff] }
 0x4a8   : > { %1416 = vst [vmem:[#allocation10 + $0x90] sm:$0xff] %v1352_v38  ;;  %1448 = vst [vmem:[#allocation10 + $0x190] sm:$0xff] %v1384_v40  ;;  %v3472_v38 = vld [vmem:[#allocation91_spill] sm:$0xff] }
 0x4a9   : > { %1417 = vst [vmem:[#allocation10 + $0x98] sm:$0xff] %v1353_v45  ;;  %1449 = vst [vmem:[#allocation10 + $0x198] sm:$0xff] %v1385_v47  ;;  %v1203_v48 = vpop.f32.mrb[20].mxu0  ;;  %v1299_v49 = vpop.f32.mrb[20].mxu1  ;;  %v3474_v45 = vld [vmem:[#allocation92_spill] sm:$0xff] }
 0x4aa   : > { %v1354_v51 = vadd.f32 %v1203_v48, %v3455_v50  ;;  %v1386_v53 = vadd.f32 %v1299_v49, %v3456_v52  ;;  %v1205_v54 = vpop.f32.mrb[21].mxu0  ;;  %v1301_v55 = vpop.f32.mrb[21].mxu1  ;;  %v3475_v49 = vld [vmem:[#allocation62_spill] sm:$0xff] }
 0x4ab   : > { %v1355_v3 = vadd.f32 %v1205_v54, %v3457_v2  ;;  %v1387_v5 = vadd.f32 %v1301_v55, %v3458_v4  ;;  %v3477_v55 = vld [vmem:[#allocation63_spill] sm:$0xff] }
 0x4ac   : > { %1418 = vst [vmem:[#allocation10 + $0xa0] sm:$0xff] %v1354_v51  ;;  %1450 = vst [vmem:[#allocation10 + $0x1a0] sm:$0xff] %v1386_v53  ;;  %v3476_v51 = vld [vmem:[#allocation93_spill] sm:$0xff] }
 0x4ad   : > { %1419 = vst [vmem:[#allocation10 + $0xa8] sm:$0xff] %v1355_v3  ;;  %1451 = vst [vmem:[#allocation10 + $0x1a8] sm:$0xff] %v1387_v5  ;;  %v1209_v6 = vpop.f32.mrb[22].mxu0  ;;  %v1305_v7 = vpop.f32.mrb[22].mxu1  ;;  %v3478_v3 = vld [vmem:[#allocation94_spill] sm:$0xff] }
 0x4ae   : > { %v1356_v9 = vadd.f32 %v1209_v6, %v3459_v8  ;;  %v1388_v11 = vadd.f32 %v1305_v7, %v3460_v10  ;;  %v1211_v12 = vpop.f32.mrb[23].mxu0  ;;  %v1307_v13 = vpop.f32.mrb[23].mxu1 }
 0x4af   : > { %v1357_v15 = vadd.f32 %v1211_v12, %v3461_v14  ;;  %v1389_v17 = vadd.f32 %v1307_v13, %v3462_v16 }
 0x4b0   : > { %1420 = vst [vmem:[#allocation10 + $0xb0] sm:$0xff] %v1356_v9  ;;  %1452 = vst [vmem:[#allocation10 + $0x1b0] sm:$0xff] %v1388_v11 }
 0x4b1   : > { %1421 = vst [vmem:[#allocation10 + $0xb8] sm:$0xff] %v1357_v15  ;;  %1453 = vst [vmem:[#allocation10 + $0x1b8] sm:$0xff] %v1389_v17  ;;  %v1215_v18 = vpop.f32.mrb[24].mxu0  ;;  %v1311_v19 = vpop.f32.mrb[24].mxu1 }
 0x4b2   : > { %v1358_v21 = vadd.f32 %v1215_v18, %v3463_v20  ;;  %v1390_v60 = vadd.f32 %v1311_v19, %v3464_v22  ;;  %v1217_v24 = vpop.f32.mrb[25].mxu0  ;;  %v1313_v30 = vpop.f32.mrb[25].mxu1 }
 0x4b3   : > { %v1359_v61 = vadd.f32 %v1217_v24, %v3465_v57  ;;  %v1391_v27 = vadd.f32 %v1313_v30, %v3466_v29 }
 0x4b4   : > { %1422 = vst [vmem:[#allocation10 + $0xc0] sm:$0xff] %v1358_v21  ;;  %1454 = vst [vmem:[#allocation10 + $0x1c0] sm:$0xff] %v1390_v60 }
 0x4b5   : > { %1423 = vst [vmem:[#allocation10 + $0xc8] sm:$0xff] %v1359_v61  ;;  %1455 = vst [vmem:[#allocation10 + $0x1c8] sm:$0xff] %v1391_v27  ;;  %v1221_v59 = vpop.f32.mrb[26].mxu0  ;;  %v1317_v0 = vpop.f32.mrb[26].mxu1 }
 0x4b6   : > { %v1360_v1 = vadd.f32 %v1221_v59, %v3467_v41  ;;  %v1392_v56 = vadd.f32 %v1317_v0, %v3468_v32  ;;  %v1223_v25 = vpop.f32.mrb[27].mxu0  ;;  %v1319_v23 = vpop.f32.mrb[27].mxu1 }
 0x4b7   : > { %v1361_v63 = vadd.f32 %v1223_v25, %v3469_v31  ;;  %v1393_v33 = vadd.f32 %v1319_v23, %v3470_v28 }
 0x4b8   : > { %1424 = vst [vmem:[#allocation10 + $0xd0] sm:$0xff] %v1360_v1  ;;  %1456 = vst [vmem:[#allocation10 + $0x1d0] sm:$0xff] %v1392_v56 }
 0x4b9   : > { %1425 = vst [vmem:[#allocation10 + $0xd8] sm:$0xff] %v1361_v63  ;;  %1457 = vst [vmem:[#allocation10 + $0x1d8] sm:$0xff] %v1393_v33  ;;  %v1227_v34 = vpop.f32.mrb[28].mxu0  ;;  %v1323_v35 = vpop.f32.mrb[28].mxu1 }
 0x4ba   : > { %v1362_v37 = vadd.f32 %v1227_v34, %v3471_v36  ;;  %v1394_v39 = vadd.f32 %v1323_v35, %v3472_v38  ;;  %v1229_v40 = vpop.f32.mrb[29].mxu0  ;;  %v1325_v42 = vpop.f32.mrb[29].mxu1 }
 0x4bb   : > { %v1363_v44 = vadd.f32 %v1229_v40, %v3473_v43  ;;  %v1395_v46 = vadd.f32 %v1325_v42, %v3474_v45 }
 0x4bc   : > { %1426 = vst [vmem:[#allocation10 + $0xe0] sm:$0xff] %v1362_v37  ;;  %1458 = vst [vmem:[#allocation10 + $0x1e0] sm:$0xff] %v1394_v39 }
 0x4bd   : > { %1427 = vst [vmem:[#allocation10 + $0xe8] sm:$0xff] %v1363_v44  ;;  %1459 = vst [vmem:[#allocation10 + $0x1e8] sm:$0xff] %v1395_v46  ;;  %v1233_v47 = vpop.f32.mrb[30].mxu0  ;;  %v1329_v48 = vpop.f32.mrb[30].mxu1 }
 0x4be   : > { %v1364_v50 = vadd.f32 %v1233_v47, %v3475_v49  ;;  %v1396_v52 = vadd.f32 %v1329_v48, %v3476_v51  ;;  %v1235_v53 = vpop.f32.mrb[31].mxu0  ;;  %v1331_v54 = vpop.f32.mrb[31].mxu1 }
 0x4bf   : > { %v1365_v2 = vadd.f32 %v1235_v53, %v3477_v55  ;;  %v1397_v4 = vadd.f32 %v1331_v54, %v3478_v3 }
 0x4c0   : > { %1428 = vst [vmem:[#allocation10 + $0xf0] sm:$0xff] %v1364_v50  ;;  %1460 = vst [vmem:[#allocation10 + $0x1f0] sm:$0xff] %v1396_v52 }
 0x4c1   : > { %1429 = vst [vmem:[#allocation10 + $0xf8] sm:$0xff] %v1365_v2  ;;  %1461 = vst [vmem:[#allocation10 + $0x1f8] sm:$0xff] %v1397_v4 }
 0x4c2 PF: > { %p1795_p6 = scmp.le.s32.totalorder %s2314_s18, 0 }
 0x4c3   : > { %v1466_v5 = vld [vmem:[#allocation10] sm:$0xff] (!%p1795_p6)  ;;  %v1467_v6 = vld [vmem:[#allocation10 + $0x8] sm:$0xff] (!%p1795_p6)  ;;  %v1468_v7 = vld [vmem:[#allocation10 + $0x10] sm:$0xff] (!%p1795_p6) }
 0x4c4   : > { %1465 = sbr.rel (%p1795_p6) target bundleno = 1270 (0x4f6), region = 60  ;;  %v1530_v8 = vadd.f32 (!%p1795_p6), %v1466_v5, %v2918_v26  ;;  %v1531_v9 = vadd.f32 (!%p1795_p6), %v1467_v6, %v2920_v58  ;;  %v3479_v10 = vld [vmem:[#allocation34_spill] sm:$0xff] (!%p1795_p6)  ;;  %v1470_v13 = vld [vmem:[#allocation10 + $0x20] sm:$0xff] (!%p1795_p6)  ;;  %v1471_v14 = vld [vmem:[#allocation10 + $0x28] sm:$0xff] (!%p1795_p6) }
 0x4c5   : > { %v1532_v11 = vadd.f32 (!%p1795_p6), %v1468_v7, %v3479_v10  ;;  %v1469_v12 = vld [vmem:[#allocation10 + $0x18] sm:$0xff] (!%p1795_p6)  ;;  %v3480_v15 = vld [vmem:[#allocation35_spill] sm:$0xff] (!%p1795_p6)  ;;  %v3481_v17 = vld [vmem:[#allocation36_spill] sm:$0xff] (!%p1795_p6) }
 0x4c6   : > { %v1533_v16 = vadd.f32 (!%p1795_p6), %v1469_v12, %v3480_v15  ;;  %v1534_v18 = vadd.f32 (!%p1795_p6), %v1470_v13, %v3481_v17  ;;  %v3482_v19 = vld [vmem:[#allocation37_spill] sm:$0xff] (!%p1795_p6)  ;;  %v1473_v22 = vld [vmem:[#allocation10 + $0x38] sm:$0xff] (!%p1795_p6)  ;;  %v1474_v60 = vld [vmem:[#allocation10 + $0x40] sm:$0xff] (!%p1795_p6)  ;;  %1594 = vst [vmem:[#allocation10] sm:$0xff] (!%p1795_p6), %v1530_v8 }
 0x4c7   : > { %v1535_v20 = vadd.f32 (!%p1795_p6), %v1471_v14, %v3482_v19  ;;  %v1472_v21 = vld [vmem:[#allocation10 + $0x30] sm:$0xff] (!%p1795_p6)  ;;  %1595 = vst [vmem:[#allocation10 + $0x8] sm:$0xff] (!%p1795_p6), %v1531_v9  ;;  %1596 = vst [vmem:[#allocation10 + $0x10] sm:$0xff] (!%p1795_p6), %v1532_v11  ;;  %v3483_v26 = vld [vmem:[#allocation38_spill] sm:$0xff] (!%p1795_p6) }
 0x4c8   : > { %v1536_v24 = vadd.f32 (!%p1795_p6), %v1472_v21, %v3483_v26  ;;  %v3484_v58 = vld [vmem:[#allocation39_spill] sm:$0xff] (!%p1795_p6)  ;;  %v3485_v57 = vld [vmem:[#allocation40_spill] sm:$0xff] (!%p1795_p6)  ;;  %v1476_v27 = vld [vmem:[#allocation10 + $0x50] sm:$0xff] (!%p1795_p6)  ;;  %1597 = vst [vmem:[#allocation10 + $0x18] sm:$0xff] (!%p1795_p6), %v1533_v16 }
 0x4c9   : > { %v1537_v30 = vadd.f32 (!%p1795_p6), %v1473_v22, %v3484_v58  ;;  %v1538_v61 = vadd.f32 (!%p1795_p6), %v1474_v60, %v3485_v57  ;;  %v1475_v29 = vld [vmem:[#allocation10 + $0x48] sm:$0xff] (!%p1795_p6)  ;;  %v1477_v59 = vld [vmem:[#allocation10 + $0x58] sm:$0xff] (!%p1795_p6)  ;;  %1598 = vst [vmem:[#allocation10 + $0x20] sm:$0xff] (!%p1795_p6), %v1534_v18  ;;  %1599 = vst [vmem:[#allocation10 + $0x28] sm:$0xff] (!%p1795_p6), %v1535_v20 }
 0x4ca   : > { %v3486_v0 = vld [vmem:[#allocation41_spill] sm:$0xff] (!%p1795_p6)  ;;  %v3487_v1 = vld [vmem:[#allocation42_spill] sm:$0xff] (!%p1795_p6)  ;;  %v3488_v56 = vld [vmem:[#allocation43_spill] sm:$0xff] (!%p1795_p6)  ;;  %1600 = vst [vmem:[#allocation10 + $0x30] sm:$0xff] (!%p1795_p6), %v1536_v24 }
 0x4cb   : > { %v1539_v41 = vadd.f32 %v1475_v29, %v3486_v0  ;;  %v1540_v32 = vadd.f32 %v1476_v27, %v3487_v1  ;;  %v1541_v25 = vadd.f32 %v1477_v59, %v3488_v56  ;;  %v1478_v23 = vld [vmem:[#allocation10 + $0x60] sm:$0xff]  ;;  %v1479_v31 = vld [vmem:[#allocation10 + $0x68] sm:$0xff]  ;;  %v1480_v63 = vld [vmem:[#allocation10 + $0x70] sm:$0xff]  ;;  %1601 = vst [vmem:[#allocation10 + $0x38] sm:$0xff] %v1537_v30 }
 0x4cc   : > { %1602 = vst [vmem:[#allocation10 + $0x40] sm:$0xff] %v1538_v61  ;;  %v3489_v28 = vld [vmem:[#allocation44_spill] sm:$0xff]  ;;  %v3490_v34 = vld [vmem:[#allocation45_spill] sm:$0xff]  ;;  %v3491_v36 = vld [vmem:[#allocation46_spill] sm:$0xff] }
 0x4cd   : > { %v1542_v33 = vadd.f32 %v1478_v23, %v3489_v28  ;;  %v1543_v35 = vadd.f32 %v1479_v31, %v3490_v34  ;;  %v1544_v37 = vadd.f32 %v1480_v63, %v3491_v36  ;;  %v1481_v38 = vld [vmem:[#allocation10 + $0x78] sm:$0xff]  ;;  %v1482_v39 = vld [vmem:[#allocation10 + $0x80] sm:$0xff]  ;;  %v1483_v40 = vld [vmem:[#allocation10 + $0x88] sm:$0xff]  ;;  %1603 = vst [vmem:[#allocation10 + $0x48] sm:$0xff] %v1539_v41 }
 0x4ce   : > { %1604 = vst [vmem:[#allocation10 + $0x50] sm:$0xff] %v1540_v32  ;;  %1605 = vst [vmem:[#allocation10 + $0x58] sm:$0xff] %v1541_v25  ;;  %v3492_v42 = vld [vmem:[#allocation47_spill] sm:$0xff]  ;;  %v3493_v44 = vld [vmem:[#allocation48_spill] sm:$0xff] }
 0x4cf   : > { %v1545_v43 = vadd.f32 %v1481_v38, %v3492_v42  ;;  %v1546_v45 = vadd.f32 %v1482_v39, %v3493_v44  ;;  %v3494_v46 = vld [vmem:[#allocation49_spill] sm:$0xff]  ;;  %v1485_v49 = vld [vmem:[#allocation10 + $0x98] sm:$0xff]  ;;  %v1486_v50 = vld [vmem:[#allocation10 + $0xa0] sm:$0xff]  ;;  %1606 = vst [vmem:[#allocation10 + $0x60] sm:$0xff] %v1542_v33 }
 0x4d0   : > { %v1547_v47 = vadd.f32 %v1483_v40, %v3494_v46  ;;  %v1484_v48 = vld [vmem:[#allocation10 + $0x90] sm:$0xff]  ;;  %1607 = vst [vmem:[#allocation10 + $0x68] sm:$0xff] %v1543_v35  ;;  %1608 = vst [vmem:[#allocation10 + $0x70] sm:$0xff] %v1544_v37  ;;  %v3495_v51 = vld [vmem:[#allocation50_spill] sm:$0xff] }
 0x4d1   : > { %v1548_v52 = vadd.f32 %v1484_v48, %v3495_v51  ;;  %v3496_v53 = vld [vmem:[#allocation51_spill] sm:$0xff]  ;;  %v3497_v55 = vld [vmem:[#allocation52_spill] sm:$0xff]  ;;  %v1488_v4 = vld [vmem:[#allocation10 + $0xb0] sm:$0xff]  ;;  %1609 = vst [vmem:[#allocation10 + $0x78] sm:$0xff] %v1545_v43 }
 0x4d2   : > { %v1549_v54 = vadd.f32 %v1485_v49, %v3496_v53  ;;  %v1550_v2 = vadd.f32 %v1486_v50, %v3497_v55  ;;  %v1487_v3 = vld [vmem:[#allocation10 + $0xa8] sm:$0xff]  ;;  %v1489_v5 = vld [vmem:[#allocation10 + $0xb8] sm:$0xff]  ;;  %1610 = vst [vmem:[#allocation10 + $0x80] sm:$0xff] %v1546_v45  ;;  %1611 = vst [vmem:[#allocation10 + $0x88] sm:$0xff] %v1547_v47 }
 0x4d3   : > { %v3498_v6 = vld [vmem:[#allocation53_spill] sm:$0xff]  ;;  %v3499_v8 = vld [vmem:[#allocation54_spill] sm:$0xff]  ;;  %v3500_v10 = vld [vmem:[#allocation55_spill] sm:$0xff]  ;;  %1612 = vst [vmem:[#allocation10 + $0x90] sm:$0xff] %v1548_v52 }
 0x4d4   : > { %v1551_v7 = vadd.f32 %v1487_v3, %v3498_v6  ;;  %v1552_v9 = vadd.f32 %v1488_v4, %v3499_v8  ;;  %v1553_v11 = vadd.f32 %v1489_v5, %v3500_v10  ;;  %v1490_v12 = vld [vmem:[#allocation10 + $0xc0] sm:$0xff]  ;;  %v1491_v13 = vld [vmem:[#allocation10 + $0xc8] sm:$0xff]  ;;  %v1492_v14 = vld [vmem:[#allocation10 + $0xd0] sm:$0xff]  ;;  %1613 = vst [vmem:[#allocation10 + $0x98] sm:$0xff] %v1549_v54 }
 0x4d5   : > { %1614 = vst [vmem:[#allocation10 + $0xa0] sm:$0xff] %v1550_v2  ;;  %v3501_v15 = vld [vmem:[#allocation56_spill] sm:$0xff]  ;;  %v3502_v17 = vld [vmem:[#allocation57_spill] sm:$0xff]  ;;  %v3503_v19 = vld [vmem:[#allocation58_spill] sm:$0xff] }
 0x4d6   : > { %v1554_v16 = vadd.f32 %v1490_v12, %v3501_v15  ;;  %v1555_v18 = vadd.f32 %v1491_v13, %v3502_v17  ;;  %v1556_v20 = vadd.f32 %v1492_v14, %v3503_v19  ;;  %v1493_v21 = vld [vmem:[#allocation10 + $0xd8] sm:$0xff]  ;;  %v1494_v22 = vld [vmem:[#allocation10 + $0xe0] sm:$0xff]  ;;  %v1495_v60 = vld [vmem:[#allocation10 + $0xe8] sm:$0xff]  ;;  %1615 = vst [vmem:[#allocation10 + $0xa8] sm:$0xff] %v1551_v7 }
 0x4d7   : > { %1616 = vst [vmem:[#allocation10 + $0xb0] sm:$0xff] %v1552_v9  ;;  %1617 = vst [vmem:[#allocation10 + $0xb8] sm:$0xff] %v1553_v11  ;;  %v3504_v26 = vld [vmem:[#allocation59_spill] sm:$0xff]  ;;  %v3505_v58 = vld [vmem:[#allocation60_spill] sm:$0xff] }
 0x4d8   : > { %v1557_v24 = vadd.f32 %v1493_v21, %v3504_v26  ;;  %v1558_v30 = vadd.f32 %v1494_v22, %v3505_v58  ;;  %v3506_v57 = vld [vmem:[#allocation61_spill] sm:$0xff]  ;;  %v1497_v27 = vld [vmem:[#allocation10 + $0xf8] sm:$0xff]  ;;  %v1498_v59 = vld [vmem:[#allocation10 + $0x100] sm:$0xff]  ;;  %1618 = vst [vmem:[#allocation10 + $0xc0] sm:$0xff] %v1554_v16 }
 0x4d9   : > { %v1559_v61 = vadd.f32 %v1495_v60, %v3506_v57  ;;  %v1496_v29 = vld [vmem:[#allocation10 + $0xf0] sm:$0xff]  ;;  %1619 = vst [vmem:[#allocation10 + $0xc8] sm:$0xff] %v1555_v18  ;;  %1620 = vst [vmem:[#allocation10 + $0xd0] sm:$0xff] %v1556_v20  ;;  %v3507_v0 = vld [vmem:[#allocation62_spill] sm:$0xff]  ;;  %v1562_v56 = vadd.f32 %v1498_v59, %v2982_v62 }
 0x4da   : > { %v1560_v41 = vadd.f32 %v1496_v29, %v3507_v0  ;;  %v3508_v1 = vld [vmem:[#allocation63_spill] sm:$0xff]  ;;  %v1499_v25 = vld [vmem:[#allocation10 + $0x108] sm:$0xff]  ;;  %v1500_v23 = vld [vmem:[#allocation10 + $0x110] sm:$0xff]  ;;  %1621 = vst [vmem:[#allocation10 + $0xd8] sm:$0xff] %v1557_v24 }
 0x4db   : > { %v1561_v32 = vadd.f32 %v1497_v27, %v3508_v1  ;;  %v1501_v31 = vld [vmem:[#allocation10 + $0x118] sm:$0xff]  ;;  %1622 = vst [vmem:[#allocation10 + $0xe0] sm:$0xff] %v1558_v30  ;;  %1623 = vst [vmem:[#allocation10 + $0xe8] sm:$0xff] %v1559_v61  ;;  %v3509_v63 = vld [vmem:[#allocation64_spill] sm:$0xff] }
 0x4dc   : > { %v1563_v28 = vadd.f32 %v1499_v25, %v3509_v63  ;;  %v3510_v33 = vld [vmem:[#allocation65_spill] sm:$0xff]  ;;  %v3511_v35 = vld [vmem:[#allocation66_spill] sm:$0xff]  ;;  %v1502_v37 = vld [vmem:[#allocation10 + $0x120] sm:$0xff]  ;;  %1624 = vst [vmem:[#allocation10 + $0xf0] sm:$0xff] %v1560_v41 }
 0x4dd   : > { %v1564_v34 = vadd.f32 %v1500_v23, %v3510_v33  ;;  %v1565_v36 = vadd.f32 %v1501_v31, %v3511_v35  ;;  %v1503_v38 = vld [vmem:[#allocation10 + $0x128] sm:$0xff]  ;;  %v1504_v39 = vld [vmem:[#allocation10 + $0x130] sm:$0xff]  ;;  %1625 = vst [vmem:[#allocation10 + $0xf8] sm:$0xff] %v1561_v32  ;;  %1626 = vst [vmem:[#allocation10 + $0x100] sm:$0xff] %v1562_v56 }
 0x4de   : > { %v3512_v40 = vld [vmem:[#allocation67_spill] sm:$0xff]  ;;  %v3513_v42 = vld [vmem:[#allocation68_spill] sm:$0xff]  ;;  %v3514_v44 = vld [vmem:[#allocation69_spill] sm:$0xff]  ;;  %1627 = vst [vmem:[#allocation10 + $0x108] sm:$0xff] %v1563_v28 }
 0x4df   : > { %v1566_v62 = vadd.f32 %v1502_v37, %v3512_v40  ;;  %v1567_v43 = vadd.f32 %v1503_v38, %v3513_v42  ;;  %v1568_v45 = vadd.f32 %v1504_v39, %v3514_v44  ;;  %v1505_v46 = vld [vmem:[#allocation10 + $0x138] sm:$0xff]  ;;  %v1506_v47 = vld [vmem:[#allocation10 + $0x140] sm:$0xff]  ;;  %v1507_v48 = vld [vmem:[#allocation10 + $0x148] sm:$0xff]  ;;  %1628 = vst [vmem:[#allocation10 + $0x110] sm:$0xff] %v1564_v34 }
 0x4e0   : > { %1629 = vst [vmem:[#allocation10 + $0x118] sm:$0xff] %v1565_v36  ;;  %v3515_v49 = vld [vmem:[#allocation70_spill] sm:$0xff]  ;;  %v3516_v51 = vld [vmem:[#allocation71_spill] sm:$0xff]  ;;  %v3517_v53 = vld [vmem:[#allocation72_spill] sm:$0xff] }
 0x4e1   : > { %v1569_v50 = vadd.f32 %v1505_v46, %v3515_v49  ;;  %v1570_v52 = vadd.f32 %v1506_v47, %v3516_v51  ;;  %v1571_v54 = vadd.f32 %v1507_v48, %v3517_v53  ;;  %v1508_v55 = vld [vmem:[#allocation10 + $0x150] sm:$0xff]  ;;  %v1509_v2 = vld [vmem:[#allocation10 + $0x158] sm:$0xff]  ;;  %v1510_v3 = vld [vmem:[#allocation10 + $0x160] sm:$0xff]  ;;  %1630 = vst [vmem:[#allocation10 + $0x120] sm:$0xff] %v1566_v62 }
 0x4e2   : > { %1631 = vst [vmem:[#allocation10 + $0x128] sm:$0xff] %v1567_v43  ;;  %1632 = vst [vmem:[#allocation10 + $0x130] sm:$0xff] %v1568_v45  ;;  %v3518_v4 = vld [vmem:[#allocation73_spill] sm:$0xff]  ;;  %v3519_v6 = vld [vmem:[#allocation74_spill] sm:$0xff] }
 0x4e3   : > { %v1572_v5 = vadd.f32 %v1508_v55, %v3518_v4  ;;  %v1573_v7 = vadd.f32 %v1509_v2, %v3519_v6  ;;  %v3520_v8 = vld [vmem:[#allocation75_spill] sm:$0xff]  ;;  %v1511_v10 = vld [vmem:[#allocation10 + $0x168] sm:$0xff]  ;;  %v1512_v11 = vld [vmem:[#allocation10 + $0x170] sm:$0xff]  ;;  %1633 = vst [vmem:[#allocation10 + $0x138] sm:$0xff] %v1569_v50 }
 0x4e4   : > { %v1574_v9 = vadd.f32 %v1510_v3, %v3520_v8  ;;  %v1513_v12 = vld [vmem:[#allocation10 + $0x178] sm:$0xff]  ;;  %1634 = vst [vmem:[#allocation10 + $0x140] sm:$0xff] %v1570_v52  ;;  %1635 = vst [vmem:[#allocation10 + $0x148] sm:$0xff] %v1571_v54  ;;  %v3521_v13 = vld [vmem:[#allocation76_spill] sm:$0xff] }
 0x4e5   : > { %v1575_v14 = vadd.f32 %v1511_v10, %v3521_v13  ;;  %v3522_v15 = vld [vmem:[#allocation77_spill] sm:$0xff]  ;;  %v3523_v17 = vld [vmem:[#allocation78_spill] sm:$0xff]  ;;  %v1514_v19 = vld [vmem:[#allocation10 + $0x180] sm:$0xff]  ;;  %1636 = vst [vmem:[#allocation10 + $0x150] sm:$0xff] %v1572_v5 }
 0x4e6   : > { %v1576_v16 = vadd.f32 %v1512_v11, %v3522_v15  ;;  %v1577_v18 = vadd.f32 %v1513_v12, %v3523_v17  ;;  %v1515_v20 = vld [vmem:[#allocation10 + $0x188] sm:$0xff]  ;;  %v1516_v21 = vld [vmem:[#allocation10 + $0x190] sm:$0xff]  ;;  %1637 = vst [vmem:[#allocation10 + $0x158] sm:$0xff] %v1573_v7  ;;  %1638 = vst [vmem:[#allocation10 + $0x160] sm:$0xff] %v1574_v9 }
 0x4e7   : > { %v3524_v22 = vld [vmem:[#allocation79_spill] sm:$0xff]  ;;  %v3525_v26 = vld [vmem:[#allocation80_spill] sm:$0xff]  ;;  %v3526_v58 = vld [vmem:[#allocation81_spill] sm:$0xff]  ;;  %1639 = vst [vmem:[#allocation10 + $0x168] sm:$0xff] %v1575_v14 }
 0x4e8   : > { %v1578_v60 = vadd.f32 %v1514_v19, %v3524_v22  ;;  %v1579_v24 = vadd.f32 %v1515_v20, %v3525_v26  ;;  %v1580_v30 = vadd.f32 %v1516_v21, %v3526_v58  ;;  %v1517_v57 = vld [vmem:[#allocation10 + $0x198] sm:$0xff]  ;;  %v1518_v61 = vld [vmem:[#allocation10 + $0x1a0] sm:$0xff]  ;;  %v1519_v29 = vld [vmem:[#allocation10 + $0x1a8] sm:$0xff]  ;;  %1640 = vst [vmem:[#allocation10 + $0x170] sm:$0xff] %v1576_v16 }
 0x4e9   : > { %1641 = vst [vmem:[#allocation10 + $0x178] sm:$0xff] %v1577_v18  ;;  %v3527_v27 = vld [vmem:[#allocation82_spill] sm:$0xff]  ;;  %v3528_v0 = vld [vmem:[#allocation83_spill] sm:$0xff]  ;;  %v3529_v1 = vld [vmem:[#allocation84_spill] sm:$0xff] }
 0x4ea   : > { %v1581_v59 = vadd.f32 %v1517_v57, %v3527_v27  ;;  %v1582_v41 = vadd.f32 %v1518_v61, %v3528_v0  ;;  %v1583_v32 = vadd.f32 %v1519_v29, %v3529_v1  ;;  %v1520_v56 = vld [vmem:[#allocation10 + $0x1b0] sm:$0xff]  ;;  %v1521_v25 = vld [vmem:[#allocation10 + $0x1b8] sm:$0xff]  ;;  %v1522_v23 = vld [vmem:[#allocation10 + $0x1c0] sm:$0xff]  ;;  %1642 = vst [vmem:[#allocation10 + $0x180] sm:$0xff] %v1578_v60 }
 0x4eb   : > { %1643 = vst [vmem:[#allocation10 + $0x188] sm:$0xff] %v1579_v24  ;;  %1644 = vst [vmem:[#allocation10 + $0x190] sm:$0xff] %v1580_v30  ;;  %v3530_v31 = vld [vmem:[#allocation85_spill] sm:$0xff]  ;;  %v3531_v28 = vld [vmem:[#allocation86_spill] sm:$0xff] }
 0x4ec   : > { %v1584_v63 = vadd.f32 %v1520_v56, %v3530_v31  ;;  %v1585_v33 = vadd.f32 %v1521_v25, %v3531_v28  ;;  %v3532_v34 = vld [vmem:[#allocation87_spill] sm:$0xff]  ;;  %v1523_v36 = vld [vmem:[#allocation10 + $0x1c8] sm:$0xff]  ;;  %v1524_v37 = vld [vmem:[#allocation10 + $0x1d0] sm:$0xff]  ;;  %1645 = vst [vmem:[#allocation10 + $0x198] sm:$0xff] %v1581_v59 }
 0x4ed   : > { %v1586_v35 = vadd.f32 %v1522_v23, %v3532_v34  ;;  %v1525_v38 = vld [vmem:[#allocation10 + $0x1d8] sm:$0xff]  ;;  %1646 = vst [vmem:[#allocation10 + $0x1a0] sm:$0xff] %v1582_v41  ;;  %1647 = vst [vmem:[#allocation10 + $0x1a8] sm:$0xff] %v1583_v32  ;;  %v3533_v39 = vld [vmem:[#allocation88_spill] sm:$0xff] }
 0x4ee   : > { %v1587_v40 = vadd.f32 %v1523_v36, %v3533_v39  ;;  %v3534_v62 = vld [vmem:[#allocation89_spill] sm:$0xff]  ;;  %v3535_v43 = vld [vmem:[#allocation90_spill] sm:$0xff]  ;;  %v1526_v45 = vld [vmem:[#allocation10 + $0x1e0] sm:$0xff]  ;;  %1648 = vst [vmem:[#allocation10 + $0x1b0] sm:$0xff] %v1584_v63 }
 0x4ef   : > { %v1588_v42 = vadd.f32 %v1524_v37, %v3534_v62  ;;  %v1589_v44 = vadd.f32 %v1525_v38, %v3535_v43  ;;  %v1527_v46 = vld [vmem:[#allocation10 + $0x1e8] sm:$0xff]  ;;  %v1528_v47 = vld [vmem:[#allocation10 + $0x1f0] sm:$0xff]  ;;  %1649 = vst [vmem:[#allocation10 + $0x1b8] sm:$0xff] %v1585_v33  ;;  %1650 = vst [vmem:[#allocation10 + $0x1c0] sm:$0xff] %v1586_v35 }
 0x4f0   : > { %v3536_v48 = vld [vmem:[#allocation91_spill] sm:$0xff]  ;;  %v3537_v50 = vld [vmem:[#allocation92_spill] sm:$0xff]  ;;  %v3538_v52 = vld [vmem:[#allocation93_spill] sm:$0xff]  ;;  %1651 = vst [vmem:[#allocation10 + $0x1c8] sm:$0xff] %v1587_v40 }
 0x4f1   : > { %v1590_v49 = vadd.f32 %v1526_v45, %v3536_v48  ;;  %v1591_v51 = vadd.f32 %v1527_v46, %v3537_v50  ;;  %v1592_v53 = vadd.f32 %v1528_v47, %v3538_v52  ;;  %v1529_v54 = vld [vmem:[#allocation10 + $0x1f8] sm:$0xff]  ;;  %1652 = vst [vmem:[#allocation10 + $0x1d0] sm:$0xff] %v1588_v42  ;;  %1653 = vst [vmem:[#allocation10 + $0x1d8] sm:$0xff] %v1589_v44 }
 0x4f2   : > { %v3539_v55 = vld [vmem:[#allocation94_spill] sm:$0xff] }
 0x4f3   : > { %v1593_v2 = vadd.f32 %v1529_v54, %v3539_v55  ;;  %1654 = vst [vmem:[#allocation10 + $0x1e0] sm:$0xff] %v1590_v49  ;;  %1655 = vst [vmem:[#allocation10 + $0x1e8] sm:$0xff] %v1591_v51 }
 0x4f4   : > { %1656 = vst [vmem:[#allocation10 + $0x1f0] sm:$0xff] %v1592_v53 }
 0x4f5   : > { %1657 = vst [vmem:[#allocation10 + $0x1f8] sm:$0xff] %v1593_v2 }
 0x4f6 PF: > { %p2061_p4 = scmp.eq.s32.totalorder %s2462_s23, 2  ;;  %s2330_s18 = smov [#allocation10]  }
 0x4f7   : > { %s1667_s11 = sshll.u32 %s2330_s18, 4  ;;  %s1668_s11 = int_to_ptr.vmem [resolvable:$true] %s1667_s11 }
 0x4f8   : > { %s2234_s24 = scalar_lea.vmem %s1668_s11, 8192  ;;  %p2241_p10 = scmp.lt.s32.totalorder %s1668_s11, %s1668_s11 }
 0x4f9   : > { %p2235_p7 = scmp.ne.s32.totalorder %s1668_s11, %s2234_s24  ;;  %p2242_p0 = scmp.lt.s32.totalorder %s2234_s24, %s2234_s24 }
 0x4fb   : > { %p2236_p9 = pnand %p2235_p7, %p2061_p4  ;;  %p2243_p8 = por %p2242_p0, %p2241_p10 }
 0x4fd   : > { %p2237_p12 = pneg %p2236_p9 }
 0x4ff   : > { %p2244_p13 = pnand %p2243_p8, %p2237_p12 }
 0x501   : > { %2247 = shalt.err (!%p2244_p13)
}
 0x502   : > { %s2248_s7 = scalar_lea.hbm %s3285_s4, 8192 }
 0x503   : > { %p2249_p2 = scmp.ne.s32.totalorder %s3285_s4, %s2248_s7  ;;  %p2254_p11 = scmp.lt.u32.totalorder %s2248_s7, %s3285_s4 }
 0x505   : > { %p2250_p3 = pnand %p2249_p2, %p2061_p4 }
 0x507   : > { %p2251_p5 = pneg %p2250_p3 }
 0x509   : > { %p2256_p1 = pnand %p2254_p11, %p2251_p5 }
 0x50b   : > { %2259 = shalt.err (!%p2256_p1)
}
 0x50c   : > { %s2331_s8 = smov 256   ;;  %s2332_s5 = smov 16  }
 0x50d   : > { %2039 = dma.vmem_to_hbm [thread:$0]  (%p2061_p4), %s1668_s11, 8192, %s3285_s4, [#allocation4], %s2331_s8, %s2331_s8, %s2332_s5  }
 0x50e   : > { %2297 = dma.done.wait (%p2061_p4), [#allocation4], 8192  }
 0x50f   : > { %2299 = vsyncadd (%p2061_p4), [#allocation4], 4294959104 }
 0x510 PF: > { %s20_s20 = sadd.s32 1, %s2322_s20   ;;  %s3540_s15 = smov %s2306_s16 }
 0x511   : > { %p17_p6 = scmp.ge.s32.totalorder %s20_s20, 5   ;;  %s3541_s16 = smov %s2310_s17 }
 0x512   : > { %s3542_s17 = smov %s2405_s27  ;;  %s3543_s18 = smov %s2318_s19 }
 0x513   : > { %s3544_s19 = smov %s3546_s21  ;;  %19 = sbr.rel (!%p17_p6) target bundleno = 7 (0x7), region = 103 }
 0x51a   :  { %1683 = vsyncpa [#allocation3], 1 }
 0x51b   :  { %1685 = vsyncpa [#allocation3 + $0x1], 1 }
 0x51c   :  { %1686 = vsyncpa [#allocation6], 1 }
 0x51d   :  { %1688 = vsyncpa [#allocation6 + $0x1], 1 }
 0x51e   :  { %1689 = vsyncpa [#allocation9], 1 }
 0x51f   :  { %1690 = vsyncpa [#allocation4], 1 }
 0x520   :  { %1692 = vsyncpa [#allocation4 + $0x1], 1 }

</bundles_post_ra>
